<compile_context>
chip_gen: v6e
topology: v6e:2x2x1
jax: 0.10.0
libtpu: 0.0.40
codegen_flags: <defaults>
</compile_context>

<pallas_src>
import jax
import jax.numpy as jnp
from jax.experimental import pallas as pl
from jax.experimental.pallas import tpu as pltpu


def _make_ce_kernel(G, D, hw_true, use_mxu, mix_dtype):
    """Builds the kernel body for static (G, D, hw_true) and mixing path."""

    def kernel(x_ref, wm_ref, w1t_ref, lng_ref, lnb_ref, w2_ref, sc_ref, o_ref):
        # x_ref  : (Bn, C, HWp) VMEM  Bn images, lane-dense (padded) spatial dim
        # wm_ref : (D, G*D) VMEM (VPU path, column layout) or (G, D, D) VMEM
        #          (MXU path); both pre-scaled by sigmoid(x_weight)
        # w1t_ref: (C, Cr)  VMEM  first Linear weight, transposed
        # lng_ref: (1, Cr)  VMEM  LayerNorm gamma
        # lnb_ref: (1, Cr)  VMEM  LayerNorm beta
        # w2_ref : (C, Cr)  VMEM  second Linear weight
        # sc_ref : (1,)     SMEM  (1 - sigmoid(x_weight)) / running_scale
        # o_ref  : (Bn, C, HWp)
        x = x_ref[...].astype(jnp.float32)               # (Bn, C, HWp)
        bn = x.shape[0]

        # --- AdaptiveReweight: fused one-pass unbiased spatial variance -----
        # Padded spatial columns are exactly zero, so dividing by the true HW
        # keeps the statistics exact.
        s1 = jnp.sum(x, axis=2, keepdims=True)           # (Bn, C, 1)
        s2 = jnp.sum(x * x, axis=2, keepdims=True)       # (Bn, C, 1)
        var = (s2 - s1 * s1 * (1.0 / hw_true)) * (1.0 / (hw_true - 1))

        # --- fc: Linear(C->Cr) -> LayerNorm(Cr) -> ReLU -> Linear(Cr->C) -> sigmoid
        w1t = w1t_ref[...]                                # (C, Cr)
        cr = w1t.shape[1]
        h = jnp.sum(var * w1t[None, :, :], axis=1, keepdims=True)       # (Bn, 1, Cr)
        mu = jnp.sum(h, axis=2, keepdims=True) * (1.0 / cr)             # (Bn, 1, 1)
        d = h - mu
        sig = jnp.sum(d * d, axis=2, keepdims=True) * (1.0 / cr)        # (Bn, 1, 1)
        hn = d * jax.lax.rsqrt(sig + 1e-5) * lng_ref[...][None] + lnb_ref[...][None]
        r = jnp.maximum(hn, 0.0)                                         # (Bn, 1, Cr)
        y = jnp.sum(r * w2_ref[...][None, :, :], axis=2, keepdims=True)  # (Bn, C, 1)
        # (1 - sigmoid(x_weight)) / running_scale is folded into sc_ref[0].
        gate = jax.nn.sigmoid(y) * sc_ref[0]              # (Bn, C, 1)

        # --- grouped channel mixing + blend (sigmoid(x_weight) folded in wm) -
        if use_mxu:
            mix_prec = (jax.lax.Precision.HIGHEST
                        if jnp.dtype(mix_dtype) == jnp.dtype(jnp.float32)
                        else jax.lax.Precision.DEFAULT)
        else:
            wm_cols = wm_ref[...]                          # (D, G*D)

        for g in range(G):
            lo = g * D
            xg = x[:, lo:lo + D, :]                        # (Bn, D, HWp)
            if use_mxu:
                wm_g = wm_ref[g].astype(mix_dtype)         # (D, D)
                for b in range(bn):
                    mixed_b = jnp.dot(wm_g, xg[b].astype(mix_dtype),
                                      preferred_element_type=jnp.float32,
                                      precision=mix_prec)  # (D, HWp)
                    o_ref[b, lo:lo + D, :] = (
                        mixed_b + gate[b, lo:lo + D, :] * xg[b]).astype(o_ref.dtype)
            else:
                # VPU broadcast-MAC: xn[:, i, :] = sum_j wm[g, i, j] * x[:, lo+j, :]
                mixed = wm_cols[:, lo:lo + 1][None] * x[:, lo:lo + 1, :]
                for j in range(1, D):
                    cin = lo + j
                    mixed = mixed + wm_cols[:, cin:cin + 1][None] * x[:, cin:cin + 1, :]
                o_ref[:, lo:lo + D, :] = (
                    mixed + gate[:, lo:lo + D, :] * xg).astype(o_ref.dtype)

    return kernel


def _pick_batch_block(N, C, HWp):
    """Images per grid step: VMEM-capped, >= 2 grid steps when N >= 2."""
    budget = 8 * 2 ** 20                    # bytes for the pipelined x/out slabs
    per_img = C * HWp * 4                   # f32 compute
    bn = max(1, budget // (4 * per_img))    # 2 operands x 2 pipeline buffers
    bn = min(bn, N)
    if N >= 2:
        bn = min(bn, (N + 1) // 2)          # keep >= 2 steps (v7x has 2 TCs)
    while N % bn:                           # uniform blocks
        bn -= 1
    return int(bn)


def ce_forward(x, w1, ln_g, ln_b, w2, running_scale, running_wm, x_weight,
               *, mix_dtype=jnp.float32):
    """Eval-mode CE forward.

    x: (N, C, H, W); w1: (Cr, C); w2: (C, Cr); ln_g/ln_b: (Cr,);
    running_scale: nonzero scalar; running_wm: (G, D, D) with G*D == C;
    x_weight: scalar.  mix_dtype: operand dtype of the MXU channel-mixing
    matmul (use jnp.bfloat16 on v6e/v7x for peak MXU rate at production C).
    """
    N, C, H, W = x.shape
    HW = H * W
    assert HW >= 2, "spatial size must be >= 2 for the unbiased variance"
    G, D, _ = running_wm.shape
    assert G * D == C, (G, D, C)
    Cr = w1.shape[0]

    xw = jax.nn.sigmoid(jnp.asarray(x_weight, jnp.float32))

    use_mxu = C > 32   # tiny C: VPU broadcast-MAC beats a <1%-utilized MXU

    if use_mxu:
        wm_arg = xw * running_wm.astype(jnp.float32)            # (G, D, D) grouped
        wm_spec_shape = (G, D, D)
    else:
        # Column layout for the VPU path: wm_cols[i, g*D + j] = xw * wm[g, i, j]
        wm_arg = xw * jnp.transpose(running_wm.astype(jnp.float32),
                                    (1, 0, 2)).reshape(D, C)     # (D, G*D) compact
        wm_spec_shape = (D, C)

    # Fold (1 - sigmoid(x_weight)) / running_scale into one SMEM scalar.
    c0 = (1.0 - xw) / jnp.asarray(running_scale, jnp.float32).reshape(())
    scalars = c0.reshape(1).astype(jnp.float32)

    # Lane-dense spatial layout, padded up to a multiple of 128 lanes.
    HWp = ((HW + 127) // 128) * 128
    x_flat = x.reshape(N, C, HW)
    if HWp != HW:
        x_flat = jnp.pad(x_flat, ((0, 0), (0, 0), (0, HWp - HW)))

    bn = _pick_batch_block(N, C, HWp)
    grid = (N // bn,)

    slab_bytes = bn * C * HWp * 4
    weight_bytes = int(wm_arg.size + w1.size + w2.size + 2 * Cr) * 4
    vmem_limit = int(min(48 * 2 ** 20,
                         max(16 * 2 ** 20, 6 * slab_bytes + 4 * weight_bytes)))

    kernel = _make_ce_kernel(G, D, HW, use_mxu, mix_dtype)

    kernel_args = (x_flat, wm_arg,
                   w1.T.astype(jnp.float32),
                   ln_g.reshape(1, Cr).astype(jnp.float32),
                   ln_b.reshape(1, Cr).astype(jnp.float32),
                   w2.astype(jnp.float32),
                   scalars)

    def run(single_buffer_weights):
        def const_spec(shape):
            if single_buffer_weights:
                # Constant index map across the grid -> one VMEM copy suffices.
                return pl.BlockSpec(shape, lambda n: (0,) * len(shape),
                                    pipeline_mode=pl.Buffered(1))
            return pl.BlockSpec(shape, lambda n: (0,) * len(shape))

        return pl.pallas_call(
            kernel,
            out_shape=jax.ShapeDtypeStruct((N, C, HWp), x.dtype),
            grid=grid,
            in_specs=[
                pl.BlockSpec((bn, C, HWp), lambda n: (n, 0, 0)),
                const_spec(wm_spec_shape),
                const_spec((C, Cr)),
                const_spec((1, Cr)),
                const_spec((1, Cr)),
                const_spec((C, Cr)),
                pl.BlockSpec(memory_space=pltpu.MemorySpace.SMEM),
            ],
            out_specs=pl.BlockSpec((bn, C, HWp), lambda n: (n, 0, 0)),
            compiler_params=pltpu.CompilerParams(
                dimension_semantics=("parallel",),
                vmem_limit_bytes=vmem_limit),
        )(*kernel_args)

    try:
        out = run(True)
    except Exception:  # Pallas build without pipeline_mode / Buffered(1) support
        out = run(False)

    if HWp != HW:
        out = out[:, :, :HW]
    return out.reshape(N, C, H, W)


def ref_forward(x, w1, ln_g, ln_b, w2, running_scale, running_wm, x_weight):
    """Pure-JAX reference matching the PyTorch CE forward in eval mode."""
    N, C, H, W = x.shape
    xf = x.astype(jnp.float32)
    # AdaptiveReweight (eval mode: scale = running_scale)
    xv = jnp.var(xf.reshape(N, C, -1), axis=-1, ddof=1)            # unbiased, like torch
    h = jnp.einsum('nc,rc->nr', xv, w1, precision=jax.lax.Precision.HIGHEST)
    mu = jnp.mean(h, axis=-1, keepdims=True)
    sg = jnp.mean((h - mu) ** 2, axis=-1, keepdims=True)
    hn = (h - mu) / jnp.sqrt(sg + 1e-5) * ln_g + ln_b
    rel = jnp.maximum(hn, 0.0)
    y = jax.nn.sigmoid(jnp.einsum('nr,cr->nc', rel, w2,
                                  precision=jax.lax.Precision.HIGHEST))
    inv = y / running_scale
    xin = inv[:, :, None, None] * xf
    # grouped whitening (eval mode: xn = running_wm @ x)
    G, D, _ = running_wm.shape
    xg = jnp.transpose(xf, (1, 0, 2, 3)).reshape(G, D, -1)
    xn = jnp.einsum('gde,gem->gdm', running_wm, xg,
                    precision=jax.lax.Precision.HIGHEST)
    Xn = xn.reshape(C, N, H, W).transpose(1, 0, 2, 3)
    xw = jax.nn.sigmoid(x_weight)
    return (xw * Xn + (1.0 - xw) * xin).astype(x.dtype)


if __name__ == "__main__":
    key = jax.random.PRNGKey(0)
    kx, k1, k2, kg, kb, kwm = jax.random.split(key, 6)

    N, C, H, W = 4, 8, 16, 16
    reduction = 4
    Cr = C // reduction

    # Group computation exactly as in CE.__init__ (num_channels starts at 64).
    num_channels = 64
    while C % num_channels != 0:
        num_channels //= 2
    num_groups = C // num_channels          # -> G = 1, D = 8 for C = 8

    x = jax.random.normal(kx, (N, C, H, W), dtype=jnp.float32)

    # Deterministic synthetic parameters / buffers (inference semantics).
    w1 = jax.random.normal(k1, (Cr, C), dtype=jnp.float32) * 0.3
    w2 = jax.random.normal(k2, (C, Cr), dtype=jnp.float32) * 0.3
    ln_g = 1.0 + 0.1 * jax.random.normal(kg, (Cr,), dtype=jnp.float32)
    ln_b = 0.1 * jax.random.normal(kb, (Cr,), dtype=jnp.float32)
    running_scale = jnp.float32(0.8)        # module inits to 0; must be nonzero in eval
    running_wm = (jnp.eye(num_channels, dtype=jnp.float32)[None]
                  + 0.05 * jax.random.normal(
                      kwm, (num_groups, num_channels, num_channels), dtype=jnp.float32))
    x_weight = jnp.float32(0.3)

    out = ce_forward(x, w1, ln_g, ln_b, w2, running_scale, running_wm, x_weight)
    jax.block_until_ready(out)

    ref = ref_forward(x, w1, ln_g, ln_b, w2, running_scale, running_wm, x_weight)
    assert out.shape == x.shape and out.dtype == x.dtype
    err = jnp.max(jnp.abs(out - ref))
    assert jnp.allclose(out, ref, atol=1e-4, rtol=1e-4), f"max abs err = {err}"

    print("KERNEL_OK")
</pallas_src>

<mosaic_0001>
module attributes {stable_mosaic.version = 11 : i64} {
  func.func @kernel(%arg0: i32, %arg1: memref<2x8x256xf32, #tpu.memory_space<vmem>>, %arg2: memref<8x8xf32, #tpu.memory_space<vmem>>, %arg3: memref<8x2xf32, #tpu.memory_space<vmem>>, %arg4: memref<1x2xf32, #tpu.memory_space<vmem>>, %arg5: memref<1x2xf32, #tpu.memory_space<vmem>>, %arg6: memref<8x2xf32, #tpu.memory_space<vmem>>, %arg7: memref<1xf32, #tpu.memory_space<smem>>, %arg8: memref<2x8x256xf32, #tpu.memory_space<vmem>>) attributes {dimension_semantics = [#tpu.dimension_semantics<parallel>], iteration_bounds = array<i64: 2>, scalar_prefetch = 0 : i64, scratch_operands = 0 : i64, tpu.core_type = #tpu.core_type<tc>, window_params = [{transform_indices = @transform_0, window_bounds = array<i64: 2, 8, 256>}, {pipeline_mode = #tpu.pipeline_mode<synchronous>, transform_indices = @transform_1, window_bounds = array<i64: 8, 8>}, {pipeline_mode = #tpu.pipeline_mode<synchronous>, transform_indices = @transform_2, window_bounds = array<i64: 8, 2>}, {pipeline_mode = #tpu.pipeline_mode<synchronous>, transform_indices = @transform_3, window_bounds = array<i64: 1, 2>}, {pipeline_mode = #tpu.pipeline_mode<synchronous>, transform_indices = @transform_4, window_bounds = array<i64: 1, 2>}, {pipeline_mode = #tpu.pipeline_mode<synchronous>, transform_indices = @transform_5, window_bounds = array<i64: 8, 2>}, {transform_indices = @transform_6, window_bounds = array<i64: 1>}, {transform_indices = @transform_7, window_bounds = array<i64: 2, 8, 256>}]} {
    %c0 = arith.constant 0 : index
    %c0_0 = arith.constant 0 : index
    %c0_1 = arith.constant 0 : index
    %0 = vector.load %arg1[%c0, %c0_0, %c0_1] : memref<2x8x256xf32, #tpu.memory_space<vmem>>, vector<2x8x256xf32>
    %cst = arith.constant dense<0.000000e+00> : vector<2x8xf32>
    %1 = vector.multi_reduction <add>, %0, %cst [2] : vector<2x8x256xf32> to vector<2x8xf32>
    %2 = vector.shape_cast %1 : vector<2x8xf32> to vector<2x8x1xf32>
    %3 = arith.mulf %0, %0 : vector<2x8x256xf32>
    %cst_2 = arith.constant dense<0.000000e+00> : vector<2x8xf32>
    %4 = vector.multi_reduction <add>, %3, %cst_2 [2] : vector<2x8x256xf32> to vector<2x8xf32>
    %5 = vector.shape_cast %4 : vector<2x8xf32> to vector<2x8x1xf32>
    %6 = arith.mulf %2, %2 : vector<2x8x1xf32>
    %cst_3 = arith.constant 3.906250e-03 : f32
    %7 = vector.broadcast %cst_3 : f32 to vector<2x8x1xf32>
    %8 = arith.mulf %6, %7 : vector<2x8x1xf32>
    %9 = arith.subf %5, %8 : vector<2x8x1xf32>
    %cst_4 = arith.constant 0.00392156886 : f32
    %10 = vector.broadcast %cst_4 : f32 to vector<2x8x1xf32>
    %11 = arith.mulf %9, %10 : vector<2x8x1xf32>
    %c0_5 = arith.constant 0 : index
    %c0_6 = arith.constant 0 : index
    %12 = vector.load %arg3[%c0_5, %c0_6] : memref<8x2xf32, #tpu.memory_space<vmem>>, vector<8x2xf32>
    %13 = vector.shape_cast %12 : vector<8x2xf32> to vector<1x8x2xf32>
    %14 = vector.broadcast %11 : vector<2x8x1xf32> to vector<2x8x2xf32>
    %15 = vector.broadcast %13 : vector<1x8x2xf32> to vector<2x8x2xf32>
    %16 = arith.mulf %14, %15 : vector<2x8x2xf32>
    %cst_7 = arith.constant dense<0.000000e+00> : vector<2x2xf32>
    %17 = vector.multi_reduction <add>, %16, %cst_7 [1] : vector<2x8x2xf32> to vector<2x2xf32>
    %18 = vector.shape_cast %17 : vector<2x2xf32> to vector<2x1x2xf32>
    %cst_8 = arith.constant dense<0.000000e+00> : vector<2x1xf32>
    %19 = vector.multi_reduction <add>, %18, %cst_8 [2] : vector<2x1x2xf32> to vector<2x1xf32>
    %20 = vector.shape_cast %19 : vector<2x1xf32> to vector<2x1x1xf32>
    %cst_9 = arith.constant 5.000000e-01 : f32
    %21 = vector.broadcast %cst_9 : f32 to vector<2x1x1xf32>
    %22 = arith.mulf %20, %21 : vector<2x1x1xf32>
    %23 = vector.broadcast %22 : vector<2x1x1xf32> to vector<2x1x2xf32>
    %24 = arith.subf %18, %23 : vector<2x1x2xf32>
    %25 = arith.mulf %24, %24 : vector<2x1x2xf32>
    %cst_10 = arith.constant dense<0.000000e+00> : vector<2x1xf32>
    %26 = vector.multi_reduction <add>, %25, %cst_10 [2] : vector<2x1x2xf32> to vector<2x1xf32>
    %27 = vector.shape_cast %26 : vector<2x1xf32> to vector<2x1x1xf32>
    %cst_11 = arith.constant 5.000000e-01 : f32
    %28 = vector.broadcast %cst_11 : f32 to vector<2x1x1xf32>
    %29 = arith.mulf %27, %28 : vector<2x1x1xf32>
    %cst_12 = arith.constant 9.99999974E-6 : f32
    %30 = vector.broadcast %cst_12 : f32 to vector<2x1x1xf32>
    %31 = arith.addf %29, %30 : vector<2x1x1xf32>
    %32 = math.rsqrt %31 : vector<2x1x1xf32>
    %33 = vector.broadcast %32 : vector<2x1x1xf32> to vector<2x1x2xf32>
    %34 = arith.mulf %24, %33 : vector<2x1x2xf32>
    %c0_13 = arith.constant 0 : index
    %c0_14 = arith.constant 0 : index
    %35 = vector.load %arg4[%c0_13, %c0_14] : memref<1x2xf32, #tpu.memory_space<vmem>>, vector<1x2xf32>
    %36 = vector.shape_cast %35 : vector<1x2xf32> to vector<1x1x2xf32>
    %37 = vector.broadcast %36 : vector<1x1x2xf32> to vector<2x1x2xf32>
    %38 = arith.mulf %34, %37 : vector<2x1x2xf32>
    %c0_15 = arith.constant 0 : index
    %c0_16 = arith.constant 0 : index
    %39 = vector.load %arg5[%c0_15, %c0_16] : memref<1x2xf32, #tpu.memory_space<vmem>>, vector<1x2xf32>
    %40 = vector.shape_cast %39 : vector<1x2xf32> to vector<1x1x2xf32>
    %41 = vector.broadcast %40 : vector<1x1x2xf32> to vector<2x1x2xf32>
    %42 = arith.addf %38, %41 : vector<2x1x2xf32>
    %cst_17 = arith.constant 0.000000e+00 : f32
    %43 = vector.broadcast %cst_17 : f32 to vector<2x1x2xf32>
    %44 = arith.maximumf %42, %43 : vector<2x1x2xf32>
    %c0_18 = arith.constant 0 : index
    %c0_19 = arith.constant 0 : index
    %45 = vector.load %arg6[%c0_18, %c0_19] : memref<8x2xf32, #tpu.memory_space<vmem>>, vector<8x2xf32>
    %46 = vector.shape_cast %45 : vector<8x2xf32> to vector<1x8x2xf32>
    %47 = vector.broadcast %44 : vector<2x1x2xf32> to vector<2x8x2xf32>
    %48 = vector.broadcast %46 : vector<1x8x2xf32> to vector<2x8x2xf32>
    %49 = arith.mulf %47, %48 : vector<2x8x2xf32>
    %cst_20 = arith.constant dense<0.000000e+00> : vector<2x8xf32>
    %50 = vector.multi_reduction <add>, %49, %cst_20 [2] : vector<2x8x2xf32> to vector<2x8xf32>
    %51 = vector.shape_cast %50 : vector<2x8xf32> to vector<2x8x1xf32>
    %52 = arith.negf %51 : vector<2x8x1xf32>
    %53 = math.exp %52 : vector<2x8x1xf32>
    %cst_21 = arith.constant 1.000000e+00 : f32
    %54 = vector.broadcast %cst_21 : f32 to vector<2x8x1xf32>
    %55 = arith.addf %54, %53 : vector<2x8x1xf32>
    %56 = arith.divf %54, %55 : vector<2x8x1xf32>
    %c0_22 = arith.constant 0 : index
    %57 = memref.load %arg7[%c0_22] : memref<1xf32, #tpu.memory_space<smem>>
    %58 = vector.broadcast %57 : f32 to vector<2x8x1xf32>
    %59 = arith.mulf %56, %58 : vector<2x8x1xf32>
    %c0_23 = arith.constant 0 : index
    %c0_24 = arith.constant 0 : index
    %60 = vector.load %arg2[%c0_23, %c0_24] : memref<8x8xf32, #tpu.memory_space<vmem>>, vector<8x8xf32>
    %61 = vector.extract_strided_slice %60 {offsets = [0, 0], sizes = [8, 1], strides = [1, 1]} : vector<8x8xf32> to vector<8x1xf32>
    %62 = vector.shape_cast %61 : vector<8x1xf32> to vector<1x8x1xf32>
    %63 = vector.extract_strided_slice %0 {offsets = [0, 0, 0], sizes = [2, 1, 256], strides = [1, 1, 1]} : vector<2x8x256xf32> to vector<2x1x256xf32>
    %64 = vector.broadcast %62 : vector<1x8x1xf32> to vector<2x8x256xf32>
    %65 = vector.broadcast %63 : vector<2x1x256xf32> to vector<2x8x256xf32>
    %66 = arith.mulf %64, %65 : vector<2x8x256xf32>
    %67 = vector.extract_strided_slice %60 {offsets = [0, 1], sizes = [8, 1], strides = [1, 1]} : vector<8x8xf32> to vector<8x1xf32>
    %68 = vector.shape_cast %67 : vector<8x1xf32> to vector<1x8x1xf32>
    %69 = vector.extract_strided_slice %0 {offsets = [0, 1, 0], sizes = [2, 1, 256], strides = [1, 1, 1]} : vector<2x8x256xf32> to vector<2x1x256xf32>
    %70 = vector.broadcast %68 : vector<1x8x1xf32> to vector<2x8x256xf32>
    %71 = vector.broadcast %69 : vector<2x1x256xf32> to vector<2x8x256xf32>
    %72 = arith.mulf %70, %71 : vector<2x8x256xf32>
    %73 = arith.addf %66, %72 : vector<2x8x256xf32>
    %74 = vector.extract_strided_slice %60 {offsets = [0, 2], sizes = [8, 1], strides = [1, 1]} : vector<8x8xf32> to vector<8x1xf32>
    %75 = vector.shape_cast %74 : vector<8x1xf32> to vector<1x8x1xf32>
    %76 = vector.extract_strided_slice %0 {offsets = [0, 2, 0], sizes = [2, 1, 256], strides = [1, 1, 1]} : vector<2x8x256xf32> to vector<2x1x256xf32>
    %77 = vector.broadcast %75 : vector<1x8x1xf32> to vector<2x8x256xf32>
    %78 = vector.broadcast %76 : vector<2x1x256xf32> to vector<2x8x256xf32>
    %79 = arith.mulf %77, %78 : vector<2x8x256xf32>
    %80 = arith.addf %73, %79 : vector<2x8x256xf32>
    %81 = vector.extract_strided_slice %60 {offsets = [0, 3], sizes = [8, 1], strides = [1, 1]} : vector<8x8xf32> to vector<8x1xf32>
    %82 = vector.shape_cast %81 : vector<8x1xf32> to vector<1x8x1xf32>
    %83 = vector.extract_strided_slice %0 {offsets = [0, 3, 0], sizes = [2, 1, 256], strides = [1, 1, 1]} : vector<2x8x256xf32> to vector<2x1x256xf32>
    %84 = vector.broadcast %82 : vector<1x8x1xf32> to vector<2x8x256xf32>
    %85 = vector.broadcast %83 : vector<2x1x256xf32> to vector<2x8x256xf32>
    %86 = arith.mulf %84, %85 : vector<2x8x256xf32>
    %87 = arith.addf %80, %86 : vector<2x8x256xf32>
    %88 = vector.extract_strided_slice %60 {offsets = [0, 4], sizes = [8, 1], strides = [1, 1]} : vector<8x8xf32> to vector<8x1xf32>
    %89 = vector.shape_cast %88 : vector<8x1xf32> to vector<1x8x1xf32>
    %90 = vector.extract_strided_slice %0 {offsets = [0, 4, 0], sizes = [2, 1, 256], strides = [1, 1, 1]} : vector<2x8x256xf32> to vector<2x1x256xf32>
    %91 = vector.broadcast %89 : vector<1x8x1xf32> to vector<2x8x256xf32>
    %92 = vector.broadcast %90 : vector<2x1x256xf32> to vector<2x8x256xf32>
    %93 = arith.mulf %91, %92 : vector<2x8x256xf32>
    %94 = arith.addf %87, %93 : vector<2x8x256xf32>
    %95 = vector.extract_strided_slice %60 {offsets = [0, 5], sizes = [8, 1], strides = [1, 1]} : vector<8x8xf32> to vector<8x1xf32>
    %96 = vector.shape_cast %95 : vector<8x1xf32> to vector<1x8x1xf32>
    %97 = vector.extract_strided_slice %0 {offsets = [0, 5, 0], sizes = [2, 1, 256], strides = [1, 1, 1]} : vector<2x8x256xf32> to vector<2x1x256xf32>
    %98 = vector.broadcast %96 : vector<1x8x1xf32> to vector<2x8x256xf32>
    %99 = vector.broadcast %97 : vector<2x1x256xf32> to vector<2x8x256xf32>
    %100 = arith.mulf %98, %99 : vector<2x8x256xf32>
    %101 = arith.addf %94, %100 : vector<2x8x256xf32>
    %102 = vector.extract_strided_slice %60 {offsets = [0, 6], sizes = [8, 1], strides = [1, 1]} : vector<8x8xf32> to vector<8x1xf32>
    %103 = vector.shape_cast %102 : vector<8x1xf32> to vector<1x8x1xf32>
    %104 = vector.extract_strided_slice %0 {offsets = [0, 6, 0], sizes = [2, 1, 256], strides = [1, 1, 1]} : vector<2x8x256xf32> to vector<2x1x256xf32>
    %105 = vector.broadcast %103 : vector<1x8x1xf32> to vector<2x8x256xf32>
    %106 = vector.broadcast %104 : vector<2x1x256xf32> to vector<2x8x256xf32>
    %107 = arith.mulf %105, %106 : vector<2x8x256xf32>
    %108 = arith.addf %101, %107 : vector<2x8x256xf32>
    %109 = vector.extract_strided_slice %60 {offsets = [0, 7], sizes = [8, 1], strides = [1, 1]} : vector<8x8xf32> to vector<8x1xf32>
    %110 = vector.shape_cast %109 : vector<8x1xf32> to vector<1x8x1xf32>
    %111 = vector.extract_strided_slice %0 {offsets = [0, 7, 0], sizes = [2, 1, 256], strides = [1, 1, 1]} : vector<2x8x256xf32> to vector<2x1x256xf32>
    %112 = vector.broadcast %110 : vector<1x8x1xf32> to vector<2x8x256xf32>
    %113 = vector.broadcast %111 : vector<2x1x256xf32> to vector<2x8x256xf32>
    %114 = arith.mulf %112, %113 : vector<2x8x256xf32>
    %115 = arith.addf %108, %114 : vector<2x8x256xf32>
    %116 = vector.broadcast %59 : vector<2x8x1xf32> to vector<2x8x256xf32>
    %117 = arith.mulf %116, %0 : vector<2x8x256xf32>
    %118 = arith.addf %115, %117 : vector<2x8x256xf32>
    %c0_25 = arith.constant 0 : index
    %c0_26 = arith.constant 0 : index
    %c0_27 = arith.constant 0 : index
    %119 = vector.load %arg8[%c0_25, %c0_26, %c0_27] : memref<2x8x256xf32, #tpu.memory_space<vmem>>, vector<2x8x256xf32>
    tpu.vector_store %arg8[%c0_25, %c0_26, %c0_27], %118 {strides = array<i32>} : memref<2x8x256xf32, #tpu.memory_space<vmem>>, vector<2x8x256xf32>,
    return
  }
  func.func @transform_0(%arg0: i32) -> (i32, i32, i32) {
    %c0_i32 = arith.constant 0 : i32
    %c0_i32_0 = arith.constant 0 : i32
    %c0_i32_1 = arith.constant 0 : i32
    return %arg0, %c0_i32, %c0_i32_0 : i32, i32, i32
  }
  func.func @transform_1(%arg0: i32) -> (i32, i32) {
    %c0_i32 = arith.constant 0 : i32
    %c0_i32_0 = arith.constant 0 : i32
    %c0_i32_1 = arith.constant 0 : i32
    return %c0_i32, %c0_i32_0 : i32, i32
  }
  func.func @transform_2(%arg0: i32) -> (i32, i32) {
    %c0_i32 = arith.constant 0 : i32
    %c0_i32_0 = arith.constant 0 : i32
    %c0_i32_1 = arith.constant 0 : i32
    return %c0_i32, %c0_i32_0 : i32, i32
  }
  func.func @transform_3(%arg0: i32) -> (i32, i32) {
    %c0_i32 = arith.constant 0 : i32
    %c0_i32_0 = arith.constant 0 : i32
    %c0_i32_1 = arith.constant 0 : i32
    return %c0_i32, %c0_i32_0 : i32, i32
  }
  func.func @transform_4(%arg0: i32) -> (i32, i32) {
    %c0_i32 = arith.constant 0 : i32
    %c0_i32_0 = arith.constant 0 : i32
    %c0_i32_1 = arith.constant 0 : i32
    return %c0_i32, %c0_i32_0 : i32, i32
  }
  func.func @transform_5(%arg0: i32) -> (i32, i32) {
    %c0_i32 = arith.constant 0 : i32
    %c0_i32_0 = arith.constant 0 : i32
    %c0_i32_1 = arith.constant 0 : i32
    return %c0_i32, %c0_i32_0 : i32, i32
  }
  func.func @transform_6(%arg0: i32) -> i32 {
    %c0_i32 = arith.constant 0 : i32
    %c0_i32_0 = arith.constant 0 : i32
    return %c0_i32 : i32
  }
  func.func @transform_7(%arg0: i32) -> (i32, i32, i32) {
    %c0_i32 = arith.constant 0 : i32
    %c0_i32_0 = arith.constant 0 : i32
    %c0_i32_1 = arith.constant 0 : i32
    return %arg0, %c0_i32, %c0_i32_0 : i32, i32, i32
  }
}

module attributes {stable_mosaic.version = 11 : i64} {
  func.func @kernel(%arg0: i32, %arg1: memref<2x8x256xf32, #tpu.memory_space<vmem>>, %arg2: memref<8x8xf32, #tpu.memory_space<vmem>>, %arg3: memref<8x2xf32, #tpu.memory_space<vmem>>, %arg4: memref<1x2xf32, #tpu.memory_space<vmem>>, %arg5: memref<1x2xf32, #tpu.memory_space<vmem>>, %arg6: memref<8x2xf32, #tpu.memory_space<vmem>>, %arg7: memref<1xf32, #tpu.memory_space<smem>>, %arg8: memref<2x8x256xf32, #tpu.memory_space<vmem>>) attributes {dimension_semantics = [#tpu.dimension_semantics<parallel>], iteration_bounds = array<i64: 2>, scalar_prefetch = 0 : i64, scratch_operands = 0 : i64, tpu.core_type = #tpu.core_type<tc>, window_params = [{transform_indices = @transform_0, window_bounds = array<i64: 2, 8, 256>}, {pipeline_mode = #tpu.pipeline_mode<synchronous>, transform_indices = @transform_1, window_bounds = array<i64: 8, 8>}, {pipeline_mode = #tpu.pipeline_mode<synchronous>, transform_indices = @transform_2, window_bounds = array<i64: 8, 2>}, {pipeline_mode = #tpu.pipeline_mode<synchronous>, transform_indices = @transform_3, window_bounds = array<i64: 1, 2>}, {pipeline_mode = #tpu.pipeline_mode<synchronous>, transform_indices = @transform_4, window_bounds = array<i64: 1, 2>}, {pipeline_mode = #tpu.pipeline_mode<synchronous>, transform_indices = @transform_5, window_bounds = array<i64: 8, 2>}, {transform_indices = @transform_6, window_bounds = array<i64: 1>}, {transform_indices = @transform_7, window_bounds = array<i64: 2, 8, 256>}]} {
    %c0 = arith.constant 0 : index
    %c0_0 = arith.constant 0 : index
    %c0_1 = arith.constant 0 : index
    %0 = vector.load %arg1[%c0, %c0_0, %c0_1] : memref<2x8x256xf32, #tpu.memory_space<vmem>>, vector<2x8x256xf32>
    %cst = arith.constant dense<0.000000e+00> : vector<2x8xf32>
    %1 = vector.multi_reduction <add>, %0, %cst [2] : vector<2x8x256xf32> to vector<2x8xf32>
    %2 = vector.shape_cast %1 : vector<2x8xf32> to vector<2x8x1xf32>
    %3 = arith.mulf %0, %0 : vector<2x8x256xf32>
    %cst_2 = arith.constant dense<0.000000e+00> : vector<2x8xf32>
    %4 = vector.multi_reduction <add>, %3, %cst_2 [2] : vector<2x8x256xf32> to vector<2x8xf32>
    %5 = vector.shape_cast %4 : vector<2x8xf32> to vector<2x8x1xf32>
    %6 = arith.mulf %2, %2 : vector<2x8x1xf32>
    %cst_3 = arith.constant 3.906250e-03 : f32
    %7 = vector.broadcast %cst_3 : f32 to vector<2x8x1xf32>
    %8 = arith.mulf %6, %7 : vector<2x8x1xf32>
    %9 = arith.subf %5, %8 : vector<2x8x1xf32>
    %cst_4 = arith.constant 0.00392156886 : f32
    %10 = vector.broadcast %cst_4 : f32 to vector<2x8x1xf32>
    %11 = arith.mulf %9, %10 : vector<2x8x1xf32>
    %c0_5 = arith.constant 0 : index
    %c0_6 = arith.constant 0 : index
    %12 = vector.load %arg3[%c0_5, %c0_6] : memref<8x2xf32, #tpu.memory_space<vmem>>, vector<8x2xf32>
    %13 = vector.shape_cast %12 : vector<8x2xf32> to vector<1x8x2xf32>
    %14 = vector.broadcast %11 : vector<2x8x1xf32> to vector<2x8x2xf32>
    %15 = vector.broadcast %13 : vector<1x8x2xf32> to vector<2x8x2xf32>
    %16 = arith.mulf %14, %15 : vector<2x8x2xf32>
    %cst_7 = arith.constant dense<0.000000e+00> : vector<2x2xf32>
    %17 = vector.multi_reduction <add>, %16, %cst_7 [1] : vector<2x8x2xf32> to vector<2x2xf32>
    %18 = vector.shape_cast %17 : vector<2x2xf32> to vector<2x1x2xf32>
    %cst_8 = arith.constant dense<0.000000e+00> : vector<2x1xf32>
    %19 = vector.multi_reduction <add>, %18, %cst_8 [2] : vector<2x1x2xf32> to vector<2x1xf32>
    %20 = vector.shape_cast %19 : vector<2x1xf32> to vector<2x1x1xf32>
    %cst_9 = arith.constant 5.000000e-01 : f32
    %21 = vector.broadcast %cst_9 : f32 to vector<2x1x1xf32>
    %22 = arith.mulf %20, %21 : vector<2x1x1xf32>
    %23 = vector.broadcast %22 : vector<2x1x1xf32> to vector<2x1x2xf32>
    %24 = arith.subf %18, %23 : vector<2x1x2xf32>
    %25 = arith.mulf %24, %24 : vector<2x1x2xf32>
    %cst_10 = arith.constant dense<0.000000e+00> : vector<2x1xf32>
    %26 = vector.multi_reduction <add>, %25, %cst_10 [2] : vector<2x1x2xf32> to vector<2x1xf32>
    %27 = vector.shape_cast %26 : vector<2x1xf32> to vector<2x1x1xf32>
    %cst_11 = arith.constant 5.000000e-01 : f32
    %28 = vector.broadcast %cst_11 : f32 to vector<2x1x1xf32>
    %29 = arith.mulf %27, %28 : vector<2x1x1xf32>
    %cst_12 = arith.constant 9.99999974E-6 : f32
    %30 = vector.broadcast %cst_12 : f32 to vector<2x1x1xf32>
    %31 = arith.addf %29, %30 : vector<2x1x1xf32>
    %32 = math.rsqrt %31 : vector<2x1x1xf32>
    %33 = vector.broadcast %32 : vector<2x1x1xf32> to vector<2x1x2xf32>
    %34 = arith.mulf %24, %33 : vector<2x1x2xf32>
    %c0_13 = arith.constant 0 : index
    %c0_14 = arith.constant 0 : index
    %35 = vector.load %arg4[%c0_13, %c0_14] : memref<1x2xf32, #tpu.memory_space<vmem>>, vector<1x2xf32>
    %36 = vector.shape_cast %35 : vector<1x2xf32> to vector<1x1x2xf32>
    %37 = vector.broadcast %36 : vector<1x1x2xf32> to vector<2x1x2xf32>
    %38 = arith.mulf %34, %37 : vector<2x1x2xf32>
    %c0_15 = arith.constant 0 : index
    %c0_16 = arith.constant 0 : index
    %39 = vector.load %arg5[%c0_15, %c0_16] : memref<1x2xf32, #tpu.memory_space<vmem>>, vector<1x2xf32>
    %40 = vector.shape_cast %39 : vector<1x2xf32> to vector<1x1x2xf32>
    %41 = vector.broadcast %40 : vector<1x1x2xf32> to vector<2x1x2xf32>
    %42 = arith.addf %38, %41 : vector<2x1x2xf32>
    %cst_17 = arith.constant 0.000000e+00 : f32
    %43 = vector.broadcast %cst_17 : f32 to vector<2x1x2xf32>
    %44 = arith.maximumf %42, %43 : vector<2x1x2xf32>
    %c0_18 = arith.constant 0 : index
    %c0_19 = arith.constant 0 : index
    %45 = vector.load %arg6[%c0_18, %c0_19] : memref<8x2xf32, #tpu.memory_space<vmem>>, vector<8x2xf32>
    %46 = vector.shape_cast %45 : vector<8x2xf32> to vector<1x8x2xf32>
    %47 = vector.broadcast %44 : vector<2x1x2xf32> to vector<2x8x2xf32>
    %48 = vector.broadcast %46 : vector<1x8x2xf32> to vector<2x8x2xf32>
    %49 = arith.mulf %47, %48 : vector<2x8x2xf32>
    %cst_20 = arith.constant dense<0.000000e+00> : vector<2x8xf32>
    %50 = vector.multi_reduction <add>, %49, %cst_20 [2] : vector<2x8x2xf32> to vector<2x8xf32>
    %51 = vector.shape_cast %50 : vector<2x8xf32> to vector<2x8x1xf32>
    %52 = arith.negf %51 : vector<2x8x1xf32>
    %53 = math.exp %52 : vector<2x8x1xf32>
    %cst_21 = arith.constant 1.000000e+00 : f32
    %54 = vector.broadcast %cst_21 : f32 to vector<2x8x1xf32>
    %55 = arith.addf %54, %53 : vector<2x8x1xf32>
    %56 = arith.divf %54, %55 : vector<2x8x1xf32>
    %c0_22 = arith.constant 0 : index
    %57 = memref.load %arg7[%c0_22] : memref<1xf32, #tpu.memory_space<smem>>
    %58 = vector.broadcast %57 : f32 to vector<2x8x1xf32>
    %59 = arith.mulf %56, %58 : vector<2x8x1xf32>
    %c0_23 = arith.constant 0 : index
    %c0_24 = arith.constant 0 : index
    %60 = vector.load %arg2[%c0_23, %c0_24] : memref<8x8xf32, #tpu.memory_space<vmem>>, vector<8x8xf32>
    %61 = vector.extract_strided_slice %60 {offsets = [0, 0], sizes = [8, 1], strides = [1, 1]} : vector<8x8xf32> to vector<8x1xf32>
    %62 = vector.shape_cast %61 : vector<8x1xf32> to vector<1x8x1xf32>
    %63 = vector.extract_strided_slice %0 {offsets = [0, 0, 0], sizes = [2, 1, 256], strides = [1, 1, 1]} : vector<2x8x256xf32> to vector<2x1x256xf32>
    %64 = vector.broadcast %62 : vector<1x8x1xf32> to vector<2x8x256xf32>
    %65 = vector.broadcast %63 : vector<2x1x256xf32> to vector<2x8x256xf32>
    %66 = arith.mulf %64, %65 : vector<2x8x256xf32>
    %67 = vector.extract_strided_slice %60 {offsets = [0, 1], sizes = [8, 1], strides = [1, 1]} : vector<8x8xf32> to vector<8x1xf32>
    %68 = vector.shape_cast %67 : vector<8x1xf32> to vector<1x8x1xf32>
    %69 = vector.extract_strided_slice %0 {offsets = [0, 1, 0], sizes = [2, 1, 256], strides = [1, 1, 1]} : vector<2x8x256xf32> to vector<2x1x256xf32>
    %70 = vector.broadcast %68 : vector<1x8x1xf32> to vector<2x8x256xf32>
    %71 = vector.broadcast %69 : vector<2x1x256xf32> to vector<2x8x256xf32>
    %72 = arith.mulf %70, %71 : vector<2x8x256xf32>
    %73 = arith.addf %66, %72 : vector<2x8x256xf32>
    %74 = vector.extract_strided_slice %60 {offsets = [0, 2], sizes = [8, 1], strides = [1, 1]} : vector<8x8xf32> to vector<8x1xf32>
    %75 = vector.shape_cast %74 : vector<8x1xf32> to vector<1x8x1xf32>
    %76 = vector.extract_strided_slice %0 {offsets = [0, 2, 0], sizes = [2, 1, 256], strides = [1, 1, 1]} : vector<2x8x256xf32> to vector<2x1x256xf32>
    %77 = vector.broadcast %75 : vector<1x8x1xf32> to vector<2x8x256xf32>
    %78 = vector.broadcast %76 : vector<2x1x256xf32> to vector<2x8x256xf32>
    %79 = arith.mulf %77, %78 : vector<2x8x256xf32>
    %80 = arith.addf %73, %79 : vector<2x8x256xf32>
    %81 = vector.extract_strided_slice %60 {offsets = [0, 3], sizes = [8, 1], strides = [1, 1]} : vector<8x8xf32> to vector<8x1xf32>
    %82 = vector.shape_cast %81 : vector<8x1xf32> to vector<1x8x1xf32>
    %83 = vector.extract_strided_slice %0 {offsets = [0, 3, 0], sizes = [2, 1, 256], strides = [1, 1, 1]} : vector<2x8x256xf32> to vector<2x1x256xf32>
    %84 = vector.broadcast %82 : vector<1x8x1xf32> to vector<2x8x256xf32>
    %85 = vector.broadcast %83 : vector<2x1x256xf32> to vector<2x8x256xf32>
    %86 = arith.mulf %84, %85 : vector<2x8x256xf32>
    %87 = arith.addf %80, %86 : vector<2x8x256xf32>
    %88 = vector.extract_strided_slice %60 {offsets = [0, 4], sizes = [8, 1], strides = [1, 1]} : vector<8x8xf32> to vector<8x1xf32>
    %89 = vector.shape_cast %88 : vector<8x1xf32> to vector<1x8x1xf32>
    %90 = vector.extract_strided_slice %0 {offsets = [0, 4, 0], sizes = [2, 1, 256], strides = [1, 1, 1]} : vector<2x8x256xf32> to vector<2x1x256xf32>
    %91 = vector.broadcast %89 : vector<1x8x1xf32> to vector<2x8x256xf32>
    %92 = vector.broadcast %90 : vector<2x1x256xf32> to vector<2x8x256xf32>
    %93 = arith.mulf %91, %92 : vector<2x8x256xf32>
    %94 = arith.addf %87, %93 : vector<2x8x256xf32>
    %95 = vector.extract_strided_slice %60 {offsets = [0, 5], sizes = [8, 1], strides = [1, 1]} : vector<8x8xf32> to vector<8x1xf32>
    %96 = vector.shape_cast %95 : vector<8x1xf32> to vector<1x8x1xf32>
    %97 = vector.extract_strided_slice %0 {offsets = [0, 5, 0], sizes = [2, 1, 256], strides = [1, 1, 1]} : vector<2x8x256xf32> to vector<2x1x256xf32>
    %98 = vector.broadcast %96 : vector<1x8x1xf32> to vector<2x8x256xf32>
    %99 = vector.broadcast %97 : vector<2x1x256xf32> to vector<2x8x256xf32>
    %100 = arith.mulf %98, %99 : vector<2x8x256xf32>
    %101 = arith.addf %94, %100 : vector<2x8x256xf32>
    %102 = vector.extract_strided_slice %60 {offsets = [0, 6], sizes = [8, 1], strides = [1, 1]} : vector<8x8xf32> to vector<8x1xf32>
    %103 = vector.shape_cast %102 : vector<8x1xf32> to vector<1x8x1xf32>
    %104 = vector.extract_strided_slice %0 {offsets = [0, 6, 0], sizes = [2, 1, 256], strides = [1, 1, 1]} : vector<2x8x256xf32> to vector<2x1x256xf32>
    %105 = vector.broadcast %103 : vector<1x8x1xf32> to vector<2x8x256xf32>
    %106 = vector.broadcast %104 : vector<2x1x256xf32> to vector<2x8x256xf32>
    %107 = arith.mulf %105, %106 : vector<2x8x256xf32>
    %108 = arith.addf %101, %107 : vector<2x8x256xf32>
    %109 = vector.extract_strided_slice %60 {offsets = [0, 7], sizes = [8, 1], strides = [1, 1]} : vector<8x8xf32> to vector<8x1xf32>
    %110 = vector.shape_cast %109 : vector<8x1xf32> to vector<1x8x1xf32>
    %111 = vector.extract_strided_slice %0 {offsets = [0, 7, 0], sizes = [2, 1, 256], strides = [1, 1, 1]} : vector<2x8x256xf32> to vector<2x1x256xf32>
    %112 = vector.broadcast %110 : vector<1x8x1xf32> to vector<2x8x256xf32>
    %113 = vector.broadcast %111 : vector<2x1x256xf32> to vector<2x8x256xf32>
    %114 = arith.mulf %112, %113 : vector<2x8x256xf32>
    %115 = arith.addf %108, %114 : vector<2x8x256xf32>
    %116 = vector.broadcast %59 : vector<2x8x1xf32> to vector<2x8x256xf32>
    %117 = arith.mulf %116, %0 : vector<2x8x256xf32>
    %118 = arith.addf %115, %117 : vector<2x8x256xf32>
    %c0_25 = arith.constant 0 : index
    %c0_26 = arith.constant 0 : index
    %c0_27 = arith.constant 0 : index
    %119 = vector.load %arg8[%c0_25, %c0_26, %c0_27] : memref<2x8x256xf32, #tpu.memory_space<vmem>>, vector<2x8x256xf32>
    tpu.vector_store %arg8[%c0_25, %c0_26, %c0_27], %118 {strides = array<i32>} : memref<2x8x256xf32, #tpu.memory_space<vmem>>, vector<2x8x256xf32>,
    return
  }
  func.func @transform_0(%arg0: i32) -> (i32, i32, i32) {
    %c0_i32 = arith.constant 0 : i32
    %c0_i32_0 = arith.constant 0 : i32
    %c0_i32_1 = arith.constant 0 : i32
    return %arg0, %c0_i32, %c0_i32_0 : i32, i32, i32
  }
  func.func @transform_1(%arg0: i32) -> (i32, i32) {
    %c0_i32 = arith.constant 0 : i32
    %c0_i32_0 = arith.constant 0 : i32
    %c0_i32_1 = arith.constant 0 : i32
    return %c0_i32, %c0_i32_0 : i32, i32
  }
  func.func @transform_2(%arg0: i32) -> (i32, i32) {
    %c0_i32 = arith.constant 0 : i32
    %c0_i32_0 = arith.constant 0 : i32
    %c0_i32_1 = arith.constant 0 : i32
    return %c0_i32, %c0_i32_0 : i32, i32
  }
  func.func @transform_3(%arg0: i32) -> (i32, i32) {
    %c0_i32 = arith.constant 0 : i32
    %c0_i32_0 = arith.constant 0 : i32
    %c0_i32_1 = arith.constant 0 : i32
    return %c0_i32, %c0_i32_0 : i32, i32
  }
  func.func @transform_4(%arg0: i32) -> (i32, i32) {
    %c0_i32 = arith.constant 0 : i32
    %c0_i32_0 = arith.constant 0 : i32
    %c0_i32_1 = arith.constant 0 : i32
    return %c0_i32, %c0_i32_0 : i32, i32
  }
  func.func @transform_5(%arg0: i32) -> (i32, i32) {
    %c0_i32 = arith.constant 0 : i32
    %c0_i32_0 = arith.constant 0 : i32
    %c0_i32_1 = arith.constant 0 : i32
    return %c0_i32, %c0_i32_0 : i32, i32
  }
  func.func @transform_6(%arg0: i32) -> i32 {
    %c0_i32 = arith.constant 0 : i32
    %c0_i32_0 = arith.constant 0 : i32
    return %c0_i32 : i32
  }
  func.func @transform_7(%arg0: i32) -> (i32, i32, i32) {
    %c0_i32 = arith.constant 0 : i32
    %c0_i32_0 = arith.constant 0 : i32
    %c0_i32_1 = arith.constant 0 : i32
    return %arg0, %c0_i32, %c0_i32_0 : i32, i32, i32
  }
}

</mosaic_0001>

<bundles_post_ra>
// kernel: tpu_custom_call.1
= control target key start
LH: loop header
LB: loop body
LE: loop exit
PB: predicated region body
PF: predicated region fallthrough
CT: control target
= control target key end

     0   :  { %s1256_s0 = inlined_call_operand.hbm [shape: f32[4,8,256], index: 0, kind: input, shape index: {}]   ;;  %s1257_s1 = inlined_call_operand.vmem [shape: f32[8,8], index: 1, kind: input, shape index: {}]   ;;  %s1258_s2 = inlined_call_operand.vmem [shape: f32[8,2], index: 2, kind: input, shape index: {}]   ;;  %s1259_s3 = inlined_call_operand.vmem [shape: f32[1,2], index: 3, kind: input, shape index: {}]   ;;  %s1260_s4 = inlined_call_operand.vmem [shape: f32[1,2], index: 4, kind: input, shape index: {}]   ;;  %s1261_s5 = inlined_call_operand.vmem [shape: f32[8,2], index: 5, kind: input, shape index: {}]   ;;  %s1262_s6 = inlined_call_operand.<no memory space> [shape: f32[1], index: 6, kind: input, shape index: {}]   ;;  %s1263_s7 = inlined_call_operand.hbm [shape: f32[4,8,256], index: 7, kind: output, shape index: {}]  }
   0x1   :  { %12 = sst [smem:[#allocation2]] %s1262_s6 }
   0x2   :  { %13 = vsyncpa [#allocation4], 0 }
   0x3   :  { %15 = vsyncpa [#allocation4 + $0x1], 0 }
   0x4   :  { %16 = vsyncpa [#allocation5], 0 }
   0x5   :  { %18 = vsyncpa [#allocation5 + $0x1], 0  ;;  %s988_s26 = smov 0   ;;  %s990_s27 = smov 0  }
   0x6   :  { %s992_s28 = smov 0   ;;  %s994_s29 = smov 0  }
   0x7 LB: > { %s1009_s6 = sadd.s32 4294967295, %s929_s29   ;;  %s736_s30 = sadd.s32 4294967294, %s929_s29   ;;  %s929_s29 = sphi %s994_s29, %s1278_s29   ;;  %s925_s28 = sphi %s992_s28, %s1277_s28   ;;  %s921_s27 = sphi %s990_s27, %s1276_s27   ;;  %s917_s26 = sphi %s988_s26, %s1275_s26  }
   0x8   : > { %s1013_s8 = sadd.s32 1, %s929_s29   ;;  %s31_s9 = sadd.s32 1, %s925_s28 }
   0x9   : > { %s28_s10 = ssub.s32 %s929_s29, %s1013_s8  ;;  %p38_p0 = scmp.ne.s32.totalorder %s925_s28, %s921_s27 }
   0xa   : > { %p29_p1 = scmp.eq.s32.totalorder %s28_s10, 0  ;;  %p39_p2 = scmp.eq.s32.totalorder %s929_s29, 0 }
   0xb   : > { %p44_p3 = scmp.ne.s32.totalorder %s921_s27, %s917_s26  ;;  %p45_p4 = scmp.eq.s32.totalorder %s1009_s6, 0 }
   0xc   : > { %s1025_s11 = scalar_select %p29_p1, %s925_s28, %s31_s9  }
   0xd   : > { %p1027_p5 = por %p39_p2, %p38_p0  ;;  %p1031_p6 = por %p45_p4, %p44_p3 }
   0xe   : > { %p194_p7 = scmp.eq.s32.totalorder %s1009_s6, 1  ;;  %p200_p8 = scmp.eq.s32.totalorder %s736_s30, 1 }
   0xf   : > { %s1267_s13 = scalar_select %p1031_p6, 1, 0 }
  0x10   : > { %p770_p10 = scmp.lt.s32.totalorder %s929_s29, 2  ;;  %p1038_p11 = por %p194_p7, %p38_p0 }
  0x11   : > { %p1042_p12 = por %p200_p8, %p44_p3  ;;  %s238_s16 = sand.u32 1, %s925_s28  }
  0x12   : > { %s1268_s14 = scalar_select %p1038_p11, 1, 0 }
  0x13   : > { %s1269_s15 = scalar_select %p1042_p12, 1, 0 }
  0x14   : > { %s755_s17 = sshll.u32 %s929_s29, 9  ;;  %s739_s18 = sshll.u32 %s238_s16, 5 }
  0x15   : > { %s1051_s21 = scalar_lea.hbm %s1256_s0, %s755_s17  ;;  %s242_s22 = scalar_lea.vmem [#allocation3], %s739_s18 }
  0x16   : > { %s250_s23 = sshll.u32 %s242_s22, 4  ;;  %p1055_p13 = pnand %p770_p10, %p1027_p5  ;;  %s1059_s23 = int_to_ptr.vmem [resolvable:$true] %s250_s23 }
  0x17   : > { %s1061_s25 = scalar_lea.sflag [#allocation4], %s238_s16  ;;  %s837_s30 = scalar_lea.hbm %s1051_s21, 512 }
  0x18   : > { %p838_p0 = scmp.ne.s32.totalorder %s1051_s21, %s837_s30  ;;  %p839_p1 = pneg %p1055_p13 }
  0x19   : > { %s842_s17 = scalar_lea.hbm %s1256_s0, 1024  ;;  %p843_p4 = scmp.lt.s32.totalorder %s1051_s21, %s1256_s0 }
  0x1a   : > { %p840_p2 = pnand %p839_p1, %p838_p0  ;;  %p844_p5 = scmp.lt.s32.totalorder %s842_s17, %s837_s30 }
  0x1c   : > { %p841_p3 = pneg %p840_p2  ;;  %p845_p7 = por %p844_p5, %p843_p4 }
  0x1e   : > { %p846_p8 = pnand %p845_p7, %p841_p3 }
  0x20   : > { %849 = shalt.err (!%p846_p8)
}
  0x21   : > { %s850_s16 = scalar_lea.vmem %s1059_s23, 512  ;;  %s931_s19 = smov [#allocation3]  }
  0x22   : > { %p851_p10 = scmp.ne.s32.totalorder %s1059_s23, %s850_s16  ;;  %s855_s20 = sshll.u32 %s931_s19, 4  ;;  %s856_s20 = int_to_ptr.vmem [resolvable:$false] %s855_s20 }
  0x23   : > { %s857_s22 = scalar_lea.vmem %s856_s20, 1024  ;;  %p858_p2 = scmp.lt.s32.totalorder %s1059_s23, %s856_s20 }
  0x24   : > { %p853_p9 = pnand %p851_p10, %p839_p1  ;;  %p859_p12 = scmp.lt.s32.totalorder %s857_s22, %s850_s16 }
  0x26   : > { %p854_p0 = pneg %p853_p9  ;;  %p860_p11 = por %p859_p12, %p858_p2 }
  0x28   : > { %p861_p6 = pnand %p860_p11, %p854_p0 }
  0x2a   : > { %864 = shalt.err (!%p861_p6)
}
  0x2b   : > { %s932_s30 = smov 256   ;;  %s933_s9 = smov 16  }
  0x2c   : > { %765 = dma.hbm_to_vmem [thread:$0]  (!%p1055_p13), %s1051_s21, 512, %s1059_s23, %s1061_s25, %s932_s30, %s932_s30, %s933_s9  }
  0x2d   : > { %p743_p9 = scmp.ge.s32.totalorder %s929_s29, 1  ;;  %p258_p1 = scmp.lt.s32.totalorder %s929_s29, 3 }
  0x2f   : > { %p259_p3 = pnand %p743_p9, %p258_p1 }
  0x30   : > { %s1085_s10 = sand.u32 (!%p259_p3), 1, %s921_s27   ;;  %p1271_p6 = scmp.ne.s32.totalorder (!%p259_p3), %s1267_s13, 0 }
  0x31   : > { %262 = sbr.rel (%p259_p3) target bundleno = 728 (0x2d8), region = 48  ;;  %s744_s17 = sshll.u32 (!%p259_p3), %s1085_s10, 5 }
  0x32   : > { %s265_s12 = scalar_lea.sflag (!%p259_p3), [#allocation4], %s1085_s10  ;;  %s268_s18 = scalar_lea.vmem (!%p259_p3), [#allocation3], %s744_s17 }
  0x36   : > { %908 = dma.done.wait (%p1271_p6), %s265_s12, 512  }
  0x37   : > { %910 = vsyncadd (%p1271_p6), %s265_s12, 4294966784  ;;  %v1095_v0 = vld [vmem:[%s268_s18] sm:$0xff]  ;;  %v1097_v1 = vld [vmem:[%s268_s18 + $0x8] sm:$0xff]  ;;  %vm332_vm0 = vcmask 15360   ;;  %v934_v43 = vmov 1   ;;  %v935_v55 = vmov 2  }
  0x38   : > { %v1099_v2 = vld [vmem:[%s268_s18 + $0x10] sm:$0xff]  ;;  %v305_v3 = vadd.f32 %v1097_v1, %v1095_v0  ;;  %v311_v4 = vmul.f32 %v1095_v0, %v1095_v0  ;;  %v312_v5 = vmul.f32 %v1097_v1, %v1097_v1  ;;  %v1107_v6 = vld [vmem:[%s268_s18 + $0x18] sm:$0xff]  ;;  %v329_v19 = vld [vmem:[%s1258_s2] sm:$0xff]  ;;  %817 = vset.pattern.permute.xlu1 %v934_v43  ;;  %v936_v56 = vmov 3   ;;  %s1181_s9 = sld [smem:[#allocation2]]  ;;  %s298_s12 = scalar_lea.vmem [#allocation6], %s744_s17 }
  0x39   : > { %v313_v7 = vmul.f32 %v1099_v2, %v1099_v2  ;;  %v314_v8 = vmul.f32 %v1107_v6, %v1107_v6  ;;  %v308_v10 = vadd.f32 %v1107_v6, %v1099_v2  ;;  %v414_v54 = vld [vmem:[%s1257_s1] sm:$0xff]  ;;  %v937_v57 = vmov 4   ;;  %s663_s18 = sshll.u32 %s298_s12, 4  ;;  %s757_s13 = sshll.u32 %s1009_s6, 9  ;;  %s1213_s18 = int_to_ptr.vmem [resolvable:$true] %s663_s18 }
  0x3a   : > { %306 = vadd.xlane.f32.xlu0 %v305_v3  ;;  %v315_v9 = vadd.f32 %v312_v5, %v311_v4  ;;  %v938_v58 = vmov 5   ;;  %v939_v59 = vmov 0   ;;  %v940_v60 = vmov 6   ;;  %s1211_s24 = scalar_lea.hbm %s1263_s7, %s757_s13  ;;  %s649_s6 = scalar_lea.sflag [#allocation5], %s1085_s10 }
  0x3b   : > { %v318_v11 = vadd.f32 %v314_v8, %v313_v7  ;;  %816 = vset.pattern.permute.xlu0 %v939_v59  ;;  %v382_v7 = vlaneseq  ;;  %s865_s17 = scalar_lea.vmem %s1213_s18, 512  ;;  %p1272_p12 = scmp.ne.s32.totalorder %s1268_s14, 0 }
  0x3c   : > { %316 = vadd.xlane.f32.xlu1 %v315_v9  ;;  %v373_v9 = vld [vmem:[%s1259_s3] sm:$0x1]  ;;  %p866_p11 = scmp.ne.s32.totalorder %s1213_s18, %s865_s17  ;;  %s942_s25 = smov [#allocation6]  }
  0x3d   : > { %s869_s16 = sshll.u32 %s942_s25, 4  ;;  %s870_s16 = int_to_ptr.vmem [resolvable:$false] %s869_s16 }
  0x3e   : > { %309 = vadd.xlane.f32.xlu0 %v308_v10  ;;  %p867_p13 = pnand %p866_p11, %p1272_p12  ;;  %s871_s19 = scalar_lea.vmem %s870_s16, 1024 }
  0x3f   : > { %p872_p5 = scmp.lt.s32.totalorder %s1213_s18, %s870_s16  ;;  %p873_p7 = scmp.lt.s32.totalorder %s871_s19, %s865_s17 }
  0x40   : > { %319 = vadd.xlane.f32.xlu1 %v318_v11  ;;  %v1130_v11 = vshrl.u32 %v382_v7, 7  ;;  %p868_p4 = pneg %p867_p13 }
  0x41   : > { %p874_p8 = por %p873_p7, %p872_p5 }
  0x42   : > { %v530_v59 = vsub.s32 4, %v1130_v11 }
  0x43   : > { %p875_p10 = pnand %p874_p8, %p868_p4 }
  0xc3   : > { %v307_v12 = vpop.xlane.xlu0 %306 }
  0xc4   : > { %v321_v13 = vmul.f32 %v307_v12, %v307_v12  ;;  %v376_v12 = vld [vmem:[%s1260_s4] sm:$0x1] }
  0xc5   : > { %v317_v14 = vpop.xlane.xlu1 %316 }
  0xc6   : > { %v323_v15 = vmul.f32 0.00390625, %v321_v13 }
  0xc7   : > { %v310_v16 = vpop.xlane.xlu0 %309 }
  0xc8   : > { %v325_v17 = vsub.f32 %v317_v14, %v323_v15  ;;  %v322_v18 = vmul.f32 %v310_v16, %v310_v16  ;;  %v384_v16 = vsub.s32 0, %v1130_v11 }
  0xc9   : > { %v320_v20 = vpop.xlane.xlu1 %319 }
  0xca   : > { %v327_v21 = vmul.f32 0.003921569, %v325_v17  ;;  %v324_v22 = vmul.f32 0.00390625, %v322_v18  ;;  %v423_v43 = vrot.slane %v1095_v0, %v384_v16 }
  0xcc   : > { %v330_v23 = vmul.f32 %v329_v19, %v327_v21  ;;  %v326_v24 = vsub.f32 %v320_v20, %v324_v22  ;;  %v381_v20 = vld [vmem:[%s1261_s5] sm:$0xff] }
  0xce   : > { %v333_v25 = vsel %vm332_vm0, %v330_v23, 0.0  ;;  %v328_v26 = vmul.f32 0.003921569, %v326_v24 }
  0xcf   : > { %v334_v27 = vrot.slane %v333_v25, 4 }
  0xd0   : > { %v331_v28 = vmul.f32 %v329_v19, %v328_v26 }
  0xd1   : > { %v335_v29 = vadd.f32 %v334_v27, %v333_v25 }
  0xd2   : > { %v340_v30 = vsel %vm332_vm0, %v331_v28, 0.0 }
  0xd3   : > { %v341_v31 = vrot.slane %v340_v30, 4  ;;  %v336_v32 = vrot.slane %v335_v29, 2 }
  0xd5   : > { %v342_v33 = vadd.f32 %v341_v31, %v340_v30  ;;  %v337_v34 = vadd.f32 %v336_v32, %v335_v29  ;;  %v941_v29 = vmov 7  }
  0xd7   : > { %v338_v35 = vrot.slane %v337_v34, 1  ;;  %v343_v36 = vrot.slane %v342_v33, 2 }
  0xd9   : > { %v339_v37 = vadd.f32 %v338_v35, %v337_v34  ;;  %v344_v38 = vadd.f32 %v343_v36, %v342_v33  ;;  %v446_v34 = vsub.s32 1, %v1130_v11 }
  0xdb   : > { %v347_v39 = vsel %vm332_vm0, %v339_v37, 0.0  ;;  %v345_v40 = vrot.slane %v344_v38, 1 }
  0xdc   : > { %348 = vadd.xlane.f32.xlu0 %v347_v39  ;;  %v474_v39 = vsub.s32 2, %v1130_v11 }
  0xdd   : > { %v346_v41 = vadd.f32 %v345_v40, %v344_v38  ;;  %v447_v38 = vrot.slane %v1095_v0, %v446_v34 }
  0xdf   : > { %v350_v42 = vsel %vm332_vm0, %v346_v41, 0.0 }
  0xe0   : > { %351 = vadd.xlane.f32.xlu1 %v350_v42 }
 0x165   : > { %v349_v44 = vpop.xlane.xlu0 %348 }
 0x166   : > { %v353_v45 = vmul.f32 0.5, %v349_v44  ;;  %v427_v44 = vrot.slane %v1097_v1, %v384_v16 }
 0x168   : > { %v355_v46 = vsub.f32 %v339_v37, %v353_v45  ;;  %v431_v45 = vrot.slane %v1099_v2, %v384_v16 }
 0x169   : > { %v352_v47 = vpop.xlane.xlu1 %351 }
 0x16a   : > { %v354_v48 = vmul.f32 0.5, %v352_v47  ;;  %v357_v49 = vmul.f32 %v355_v46, %v355_v46  ;;  %v502_v47 = vsub.s32 3, %v1130_v11 }
 0x16c   : > { %v356_v50 = vsub.f32 %v346_v41, %v354_v48  ;;  %v359_v51 = vsel %vm332_vm0, %v357_v49, 0.0  ;;  %v451_v41 = vrot.slane %v1097_v1, %v446_v34  ;;  %v455_v48 = vrot.slane %v1099_v2, %v446_v34 }
 0x16d   : > { %360 = vadd.xlane.f32.xlu0 %v359_v51  ;;  %v459_v49 = vrot.slane %v1107_v6, %v446_v34  ;;  %v479_v51 = vrot.slane %v1097_v1, %v474_v39 }
 0x16e   : > { %v358_v52 = vmul.f32 %v356_v50, %v356_v50 }
 0x170   : > { %v362_v53 = vsel %vm332_vm0, %v358_v52, 0.0 }
 0x171   : > { %363 = vadd.xlane.f32.xlu1 %v362_v53 }
 0x182   : > { %441 = vperm.xlu1 %817, %v414_v54  }
 0x186   : > { %818 = vset.pattern.permute.xlu1 %v935_v55 }
 0x187   : > { %469 = vperm.xlu1 %818, %v414_v54  }
 0x18b   : > { %819 = vset.pattern.permute.xlu1 %v936_v56 }
 0x18c   : > { %497 = vperm.xlu1 %819, %v414_v54  }
 0x190   : > { %820 = vset.pattern.permute.xlu1 %v937_v57 }
 0x191   : > { %525 = vperm.xlu1 %820, %v414_v54  }
 0x195   : > { %821 = vset.pattern.permute.xlu1 %v938_v58 }
 0x196   : > { %553 = vperm.xlu1 %821, %v414_v54  }
 0x19a   : > { %822 = vset.pattern.permute.xlu1 %v940_v60 }
 0x1f6   : > { %v361_v61 = vpop.xlane.xlu0 %360 }
 0x1f7   : > { %v365_v62 = vmul.f32 0.5, %v361_v61 }
 0x1f9   : > { %v367_v63 = vadd.f32 1e-05, %v365_v62 }
 0x1fa   : > { %v364_v3 = vpop.xlane.xlu1 %363 }
 0x1fb   : > { %825 = vrsqrt.f32 %v367_v63  ;;  %v366_v4 = vmul.f32 0.5, %v364_v3  ;;  %v483_v3 = vrot.slane %v1099_v2, %v474_v39 }
 0x1fd   : > { %v368_v5 = vadd.f32 1e-05, %v366_v4  ;;  %v487_v4 = vrot.slane %v1107_v6, %v474_v39 }
 0x1fe   : > { %v442_v30 = vpop.permute.xlu1 %441 }
 0x1ff   : > { %827 = vrsqrt.f32 %v368_v5  ;;  %v460_v53 = vmul.f32 %v447_v38, %v442_v30  ;;  %v462_v62 = vmul.f32 %v455_v48, %v442_v30  ;;  %v463_v63 = vmul.f32 %v459_v49, %v442_v30 }
 0x200   : > { %v543_v38 = vrot.slane %v1107_v6, %v530_v59 }
 0x202   : > { %v470_v31 = vpop.permute.xlu1 %469 }
 0x203   : > { %v489_v7 = vmul.f32 %v479_v51, %v470_v31 }
 0x207   : > { %v1141_v32 = vpop.permute.xlu1 %497 }
 0x208   : > { %v826_v8 = vpop.eup %825 }
 0x209   : > { %v371_v10 = vmul.f32 %v826_v8, %v355_v46  ;;  %v435_v46 = vrot.slane %v1107_v6, %v384_v16  ;;  %v503_v8 = vrot.slane %v1095_v0, %v502_v47 }
 0x20b   : > { %v374_v13 = vmul.f32 %v373_v9, %v371_v10 }
 0x20c   : > { %v828_v14 = vpop.eup %827  ;;  %v1143_v33 = vpop.permute.xlu1 %525 }
 0x20d   : > { %v377_v15 = vadd.f32 %v376_v12, %v374_v13  ;;  %v372_v17 = vmul.f32 %v828_v14, %v356_v50  ;;  %v475_v50 = vrot.slane %v1095_v0, %v474_v39  ;;  %v511_v13 = vrot.slane %v1099_v2, %v502_v47 }
 0x20e   : > { %v558_v14 = vsub.s32 5, %v1130_v11 }
 0x20f   : > { %v379_v18 = vmax.f32 %v377_v15, 0.0  ;;  %v375_v19 = vmul.f32 %v373_v9, %v372_v17  ;;  %v488_v5 = vmul.f32 %v475_v50, %v470_v31  ;;  %v507_v9 = vrot.slane %v1097_v1, %v502_v47 }
 0x210   : > { %v559_v39 = vrot.slane %v1095_v0, %v558_v14 }
 0x211   : > { %v385_v21 = vrot.slane %v379_v18, %v384_v16  ;;  %v378_v22 = vadd.f32 %v376_v12, %v375_v19  ;;  %v1146_v35 = vpop.permute.xlu1 %553  ;;  %v490_v18 = vmul.f32 %v483_v3, %v470_v31  ;;  %v491_v19 = vmul.f32 %v487_v4, %v470_v31 }
 0x213   : > { %v390_v23 = vmul.f32 %v385_v21, %v381_v20  ;;  %v380_v24 = vmax.f32 %v378_v22, 0.0  ;;  %v531_v21 = vrot.slane %v1095_v0, %v530_v59  ;;  %v516_v22 = vmul.f32 %v503_v8, %v1141_v32 }
 0x214   : > { %v411_v8 = vstv %s1181_s9 }
 0x215   : > { %v392_v25 = vsel %vm332_vm0, %v390_v23, 0.0  ;;  %v389_v26 = vrot.slane %v380_v24, %v384_v16  ;;  %v517_v23 = vmul.f32 %v507_v9, %v1141_v32  ;;  %v535_v24 = vrot.slane %v1097_v1, %v530_v59 }
 0x216   : > { %393 = vadd.xlane.f32.xlu0 %v392_v25 }
 0x217   : > { %v391_v27 = vmul.f32 %v389_v26, %v381_v20  ;;  %v515_v20 = vrot.slane %v1107_v6, %v502_v47 }
 0x219   : > { %v395_v28 = vsel %vm332_vm0, %v391_v27, 0.0 }
 0x21a   : > { %396 = vadd.xlane.f32.xlu1 %v395_v28  ;;  %v586_v28 = vsub.s32 6, %v1130_v11 }
 0x21c   : > { %v591_v48 = vrot.slane %v1097_v1, %v586_v28 }
 0x22b   : > { %581 = vperm.xlu1 %822, %v414_v54  }
 0x22c   : > { %417 = vperm.xlu0 %816, %v414_v54  }
 0x22f   : > { %823 = vset.pattern.permute.xlu1 %v941_v29 }
 0x230   : > { %609 = vperm.xlu1 %823, %v414_v54   ;;  %824 = vset.pattern.permute.xlu0 %v941_v29  ;;  %v461_v54 = vmul.f32 %v451_v41, %v442_v30  ;;  %v539_v29 = vrot.slane %v1099_v2, %v530_v59  ;;  %v545_v41 = vmul.f32 %v535_v24, %v1143_v33 }
 0x232   : > { %v546_v51 = vmul.f32 %v539_v29, %v1143_v33 }
 0x29f   : > { %v394_v36 = vpop.xlane.xlu0 %393 }
 0x2a0   : > { %v746_v37 = vmul.f32 -1.442695, %v394_v36  ;;  %v518_v36 = vmul.f32 %v511_v13, %v1141_v32 }
 0x2a2   : > { %829 = vpow2.f32 %v746_v37  ;;  %v519_v37 = vmul.f32 %v515_v20, %v1141_v32  ;;  %v614_v32 = vsub.s32 7, %v1130_v11  ;;  %v595_v11 = vrot.slane %v1099_v2, %v586_v28 }
 0x2a3   : > { %v397_v40 = vpop.xlane.xlu1 %396 }
 0x2a4   : > { %v747_v42 = vmul.f32 -1.442695, %v397_v40  ;;  %v544_v40 = vmul.f32 %v531_v21, %v1143_v33  ;;  %v619_v59 = vrot.slane %v1097_v1, %v614_v32  ;;  %v623_v9 = vrot.slane %v1099_v2, %v614_v32 }
 0x2a6   : > { %831 = vpow2.f32 %v747_v42  ;;  %v563_v42 = vrot.slane %v1097_v1, %v558_v14 }
 0x2a7   : > { %v418_v52 = vpop.permute.xlu0 %417  ;;  %v582_v47 = vpop.permute.xlu1 %581 }
 0x2a8   : > { %v436_v55 = vmul.f32 %v423_v43, %v418_v52  ;;  %v437_v56 = vmul.f32 %v427_v44, %v418_v52  ;;  %v438_v57 = vmul.f32 %v431_v45, %v418_v52  ;;  %v439_v58 = vmul.f32 %v435_v46, %v418_v52 }
 0x2a9   : > { %v587_v46 = vrot.slane %v1095_v0, %v586_v28  ;;  %v547_v52 = vmul.f32 %v543_v38, %v1143_v33 }
 0x2aa   : > { %v464_v60 = vadd.f32 %v460_v53, %v436_v55  ;;  %v465_v61 = vadd.f32 %v461_v54, %v437_v56  ;;  %v466_v10 = vadd.f32 %v462_v62, %v438_v57  ;;  %v467_v12 = vadd.f32 %v463_v63, %v439_v58 }
 0x2ab   : > { %v567_v53 = vrot.slane %v1099_v2, %v558_v14  ;;  %v571_v54 = vrot.slane %v1107_v6, %v558_v14  ;;  %v572_v55 = vmul.f32 %v559_v39, %v1146_v35  ;;  %v573_v56 = vmul.f32 %v563_v42, %v1146_v35 }
 0x2ac   : > { %v492_v15 = vadd.f32 %v488_v5, %v464_v60  ;;  %v493_v16 = vadd.f32 %v489_v7, %v465_v61  ;;  %v494_v26 = vadd.f32 %v490_v18, %v466_v10  ;;  %v495_v27 = vadd.f32 %v491_v19, %v467_v12  ;;  %v610_v7 = vpop.permute.xlu1 %609 }
 0x2ad   : > { %v599_v57 = vrot.slane %v1107_v6, %v586_v28  ;;  %v615_v58 = vrot.slane %v1095_v0, %v614_v32  ;;  %v600_v33 = vmul.f32 %v587_v46, %v582_v47  ;;  %v601_v62 = vmul.f32 %v591_v48, %v582_v47 }
 0x2ae   : > { %v520_v30 = vadd.f32 %v516_v22, %v492_v15  ;;  %v521_v31 = vadd.f32 %v517_v23, %v493_v16  ;;  %v522_v44 = vadd.f32 %v518_v36, %v494_v26  ;;  %v523_v45 = vadd.f32 %v519_v37, %v495_v27 }
 0x2af   : > { %v830_v17 = vpop.eup %829  ;;  %v574_v4 = vmul.f32 %v567_v53, %v1146_v35  ;;  %v575_v5 = vmul.f32 %v571_v54, %v1146_v35  ;;  %v627_v10 = vrot.slane %v1107_v6, %v614_v32  ;;  %v602_v12 = vmul.f32 %v595_v11, %v582_v47 }
 0x2b0   : > { %v404_v25 = vadd.f32 1.0, %v830_v17  ;;  %v548_v49 = vadd.f32 %v544_v40, %v520_v30  ;;  %v549_v50 = vadd.f32 %v545_v41, %v521_v31  ;;  %v550_v60 = vadd.f32 %v546_v51, %v522_v44 }
 0x2b1   : > { %v551_v61 = vadd.f32 %v547_v52, %v523_v45  ;;  %v603_v13 = vmul.f32 %v599_v57, %v582_v47  ;;  %v628_v18 = vmul.f32 %v615_v58, %v610_v7  ;;  %v629_v19 = vmul.f32 %v619_v59, %v610_v7 }
 0x2b2   : > { %833 = vrcp.f32 %v404_v25  ;;  %v576_v63 = vadd.f32 %v572_v55, %v548_v49  ;;  %v577_v3 = vadd.f32 %v573_v56, %v549_v50  ;;  %v578_v14 = vadd.f32 %v574_v4, %v550_v60 }
 0x2b3   : > { %v832_v34 = vpop.eup %831  ;;  %v579_v15 = vadd.f32 %v575_v5, %v551_v61  ;;  %v630_v23 = vmul.f32 %v623_v9, %v610_v7  ;;  %v631_v24 = vmul.f32 %v627_v10, %v610_v7 }
 0x2b4   : > { %v405_v43 = vadd.f32 1.0, %v832_v34  ;;  %v604_v16 = vadd.f32 %v600_v33, %v576_v63  ;;  %v605_v17 = vadd.f32 %v601_v62, %v577_v3  ;;  %v606_v22 = vadd.f32 %v602_v12, %v578_v14 }
 0x2b5   : > { %v607_v35 = vadd.f32 %v603_v13, %v579_v15 }
 0x2b6   : > { %835 = vrcp.f32 %v405_v43  ;;  %v632_v25 = vadd.f32 %v628_v18, %v604_v16  ;;  %v633_v26 = vadd.f32 %v629_v19, %v605_v17  ;;  %v634_v38 = vadd.f32 %v630_v23, %v606_v22 }
 0x2b7   : > { %v635_v39 = vadd.f32 %v631_v24, %v607_v35 }
 0x2bf   : > { %v834_v20 = vpop.eup %833 }
 0x2c0   : > { %v412_v21 = vmul.f32 %v834_v20, %v411_v8 }
 0x2c2   : > { %v636_v27 = vmul.f32 %v412_v21, %v1095_v0  ;;  %v637_v28 = vmul.f32 %v412_v21, %v1097_v1 }
 0x2c3   : > { %v836_v29 = vpop.eup %835 }
 0x2c4   : > { %v413_v30 = vmul.f32 %v836_v29, %v411_v8  ;;  %v640_v31 = vadd.f32 %v636_v27, %v632_v25  ;;  %v641_v34 = vadd.f32 %v637_v28, %v633_v26 }
 0x2c6   : > { %v638_v36 = vmul.f32 %v413_v30, %v1099_v2  ;;  %v639_v37 = vmul.f32 %v413_v30, %v1107_v6  ;;  %644 = vst [vmem:[%s298_s12] sm:$0xff] %v640_v31  ;;  %645 = vst [vmem:[%s298_s12 + $0x8] sm:$0xff] %v641_v34 }
 0x2c8   : > { %v642_v0 = vadd.f32 %v638_v36, %v634_v38  ;;  %v643_v1 = vadd.f32 %v639_v37, %v635_v39 }
 0x2ca   : > { %646 = vst [vmem:[%s298_s12 + $0x10] sm:$0xff] %v642_v0  ;;  %647 = vst [vmem:[%s298_s12 + $0x18] sm:$0xff] %v643_v1 }
 0x2cb   : > { %878 = shalt.err (!%p875_p10)
}
 0x2cc   : > { %s879_s20 = scalar_lea.hbm %s1211_s24, 512  ;;  %s883_s9 = scalar_lea.hbm %s1263_s7, 1024 }
 0x2cd   : > { %p880_p0 = scmp.ne.s32.totalorder %s1211_s24, %s879_s20  ;;  %p884_p1 = scmp.lt.s32.totalorder %s1211_s24, %s1263_s7 }
 0x2ce   : > { %p885_p3 = scmp.lt.s32.totalorder %s883_s9, %s879_s20 }
 0x2cf   : > { %p881_p2 = pnand %p880_p0, %p1272_p12 }
 0x2d0   : > { %p886_p6 = por %p885_p3, %p884_p1 }
 0x2d1   : > { %p882_p9 = pneg %p881_p2 }
 0x2d3   : > { %p887_p11 = pnand %p886_p6, %p882_p9 }
 0x2d5   : > { %890 = shalt.err (!%p887_p11)
}
 0x2d6   : > { %s943_s21 = smov 256   ;;  %s944_s23 = smov 16  }
 0x2d7   : > { %760 = dma.vmem_to_hbm [thread:$0]  (%p1272_p12), %s1213_s18, 512, %s1211_s24, %s649_s6, %s943_s21, %s943_s21, %s944_s23  }
 0x2d8 PF: > { %s678_s17 = sand.u32 1, %s917_s26   ;;  %p1273_p13 = scmp.ne.s32.totalorder %s1269_s15, 0 }
 0x2d9   : > { %p1274_p4 = scmp.ge.s32.totalorder %s929_s29, 2  ;;  %s679_s25 = scalar_lea.sflag [#allocation5], %s678_s17 }
 0x2db   : > { %p767_p5 = pnand %p1274_p4, %p1273_p13 }
 0x2dd   : > { %p768_p7 = pneg %p767_p5 }
 0x2df   : > { %912 = dma.done.wait (%p768_p7), %s679_s25, 512  }
 0x2e0   : > { %914 = vsyncadd (%p768_p7), %s679_s25, 4294966784  ;;  %p21_p8 = scmp.ge.s32.totalorder %s1013_s8, 4   ;;  %s1275_s26 = smov %s921_s27 }
 0x2e1   : > { %s1276_s27 = smov %s925_s28  ;;  %s1277_s28 = smov %s1025_s11 }
 0x2e2   : > { %s1278_s29 = smov %s1013_s8  ;;  %23 = sbr.rel (!%p21_p8) target bundleno = 7 (0x7), region = 93 }
 0x2e7   :  { %684 = vsyncpa [#allocation4], 1 }
 0x2e8   :  { %686 = vsyncpa [#allocation4 + $0x1], 1 }
 0x2e9   :  { %687 = vsyncpa [#allocation5], 1 }
 0x2ea   :  { %689 = vsyncpa [#allocation5 + $0x1], 1 }

// kernel: tpu_custom_call.1
= control target key start
LH: loop header
LB: loop body
LE: loop exit
PB: predicated region body
PF: predicated region fallthrough
CT: control target
= control target key end

     0   :  { %s1256_s0 = inlined_call_operand.hbm [shape: f32[4,8,256], index: 0, kind: input, shape index: {}]   ;;  %s1257_s1 = inlined_call_operand.vmem [shape: f32[8,8], index: 1, kind: input, shape index: {}]   ;;  %s1258_s2 = inlined_call_operand.vmem [shape: f32[8,2], index: 2, kind: input, shape index: {}]   ;;  %s1259_s3 = inlined_call_operand.vmem [shape: f32[1,2], index: 3, kind: input, shape index: {}]   ;;  %s1260_s4 = inlined_call_operand.vmem [shape: f32[1,2], index: 4, kind: input, shape index: {}]   ;;  %s1261_s5 = inlined_call_operand.vmem [shape: f32[8,2], index: 5, kind: input, shape index: {}]   ;;  %s1262_s6 = inlined_call_operand.<no memory space> [shape: f32[1], index: 6, kind: input, shape index: {}]   ;;  %s1263_s7 = inlined_call_operand.hbm [shape: f32[4,8,256], index: 7, kind: output, shape index: {}]  }
   0x1   :  { %12 = sst [smem:[#allocation2]] %s1262_s6 }
   0x2   :  { %13 = vsyncpa [#allocation4], 0 }
   0x3   :  { %15 = vsyncpa [#allocation4 + $0x1], 0 }
   0x4   :  { %16 = vsyncpa [#allocation5], 0 }
   0x5   :  { %18 = vsyncpa [#allocation5 + $0x1], 0  ;;  %s988_s26 = smov 0   ;;  %s990_s27 = smov 0  }
   0x6   :  { %s992_s28 = smov 0   ;;  %s994_s29 = smov 0  }
   0x7 LB: > { %s1009_s6 = sadd.s32 4294967295, %s929_s29   ;;  %s736_s30 = sadd.s32 4294967294, %s929_s29   ;;  %s929_s29 = sphi %s994_s29, %s1278_s29   ;;  %s925_s28 = sphi %s992_s28, %s1277_s28   ;;  %s921_s27 = sphi %s990_s27, %s1276_s27   ;;  %s917_s26 = sphi %s988_s26, %s1275_s26  }
   0x8   : > { %s1013_s8 = sadd.s32 1, %s929_s29   ;;  %s31_s9 = sadd.s32 1, %s925_s28 }
   0x9   : > { %s28_s10 = ssub.s32 %s929_s29, %s1013_s8  ;;  %p38_p0 = scmp.ne.s32.totalorder %s925_s28, %s921_s27 }
   0xa   : > { %p29_p1 = scmp.eq.s32.totalorder %s28_s10, 0  ;;  %p39_p2 = scmp.eq.s32.totalorder %s929_s29, 0 }
   0xb   : > { %p44_p3 = scmp.ne.s32.totalorder %s921_s27, %s917_s26  ;;  %p45_p4 = scmp.eq.s32.totalorder %s1009_s6, 0 }
   0xc   : > { %s1025_s11 = scalar_select %p29_p1, %s925_s28, %s31_s9  }
   0xd   : > { %p1027_p5 = por %p39_p2, %p38_p0  ;;  %p1031_p6 = por %p45_p4, %p44_p3 }
   0xe   : > { %p194_p7 = scmp.eq.s32.totalorder %s1009_s6, 1  ;;  %p200_p8 = scmp.eq.s32.totalorder %s736_s30, 1 }
   0xf   : > { %s1267_s13 = scalar_select %p1031_p6, 1, 0 }
  0x10   : > { %p770_p10 = scmp.lt.s32.totalorder %s929_s29, 2  ;;  %p1038_p11 = por %p194_p7, %p38_p0 }
  0x11   : > { %p1042_p12 = por %p200_p8, %p44_p3  ;;  %s238_s16 = sand.u32 1, %s925_s28  }
  0x12   : > { %s1268_s14 = scalar_select %p1038_p11, 1, 0 }
  0x13   : > { %s1269_s15 = scalar_select %p1042_p12, 1, 0 }
  0x14   : > { %s755_s17 = sshll.u32 %s929_s29, 9  ;;  %s739_s18 = sshll.u32 %s238_s16, 5 }
  0x15   : > { %s1051_s21 = scalar_lea.hbm %s1256_s0, %s755_s17  ;;  %s242_s22 = scalar_lea.vmem [#allocation3], %s739_s18 }
  0x16   : > { %s250_s23 = sshll.u32 %s242_s22, 4  ;;  %p1055_p13 = pnand %p770_p10, %p1027_p5  ;;  %s1059_s23 = int_to_ptr.vmem [resolvable:$true] %s250_s23 }
  0x17   : > { %s1061_s25 = scalar_lea.sflag [#allocation4], %s238_s16  ;;  %s837_s30 = scalar_lea.hbm %s1051_s21, 512 }
  0x18   : > { %p838_p0 = scmp.ne.s32.totalorder %s1051_s21, %s837_s30  ;;  %p839_p1 = pneg %p1055_p13 }
  0x19   : > { %s842_s17 = scalar_lea.hbm %s1256_s0, 1024  ;;  %p843_p4 = scmp.lt.s32.totalorder %s1051_s21, %s1256_s0 }
  0x1a   : > { %p840_p2 = pnand %p839_p1, %p838_p0  ;;  %p844_p5 = scmp.lt.s32.totalorder %s842_s17, %s837_s30 }
  0x1c   : > { %p841_p3 = pneg %p840_p2  ;;  %p845_p7 = por %p844_p5, %p843_p4 }
  0x1e   : > { %p846_p8 = pnand %p845_p7, %p841_p3 }
  0x20   : > { %849 = shalt.err (!%p846_p8)
}
  0x21   : > { %s850_s16 = scalar_lea.vmem %s1059_s23, 512  ;;  %s931_s19 = smov [#allocation3]  }
  0x22   : > { %p851_p10 = scmp.ne.s32.totalorder %s1059_s23, %s850_s16  ;;  %s855_s20 = sshll.u32 %s931_s19, 4  ;;  %s856_s20 = int_to_ptr.vmem [resolvable:$false] %s855_s20 }
  0x23   : > { %s857_s22 = scalar_lea.vmem %s856_s20, 1024  ;;  %p858_p2 = scmp.lt.s32.totalorder %s1059_s23, %s856_s20 }
  0x24   : > { %p853_p9 = pnand %p851_p10, %p839_p1  ;;  %p859_p12 = scmp.lt.s32.totalorder %s857_s22, %s850_s16 }
  0x26   : > { %p854_p0 = pneg %p853_p9  ;;  %p860_p11 = por %p859_p12, %p858_p2 }
  0x28   : > { %p861_p6 = pnand %p860_p11, %p854_p0 }
  0x2a   : > { %864 = shalt.err (!%p861_p6)
}
  0x2b   : > { %s932_s30 = smov 256   ;;  %s933_s9 = smov 16  }
  0x2c   : > { %765 = dma.hbm_to_vmem [thread:$0]  (!%p1055_p13), %s1051_s21, 512, %s1059_s23, %s1061_s25, %s932_s30, %s932_s30, %s933_s9  }
  0x2d   : > { %p743_p9 = scmp.ge.s32.totalorder %s929_s29, 1  ;;  %p258_p1 = scmp.lt.s32.totalorder %s929_s29, 3 }
  0x2f   : > { %p259_p3 = pnand %p743_p9, %p258_p1 }
  0x30   : > { %s1085_s10 = sand.u32 (!%p259_p3), 1, %s921_s27   ;;  %p1271_p6 = scmp.ne.s32.totalorder (!%p259_p3), %s1267_s13, 0 }
  0x31   : > { %262 = sbr.rel (%p259_p3) target bundleno = 728 (0x2d8), region = 48  ;;  %s744_s17 = sshll.u32 (!%p259_p3), %s1085_s10, 5 }
  0x32   : > { %s265_s12 = scalar_lea.sflag (!%p259_p3), [#allocation4], %s1085_s10  ;;  %s268_s18 = scalar_lea.vmem (!%p259_p3), [#allocation3], %s744_s17 }
  0x36   : > { %908 = dma.done.wait (%p1271_p6), %s265_s12, 512  }
  0x37   : > { %910 = vsyncadd (%p1271_p6), %s265_s12, 4294966784  ;;  %v1095_v0 = vld [vmem:[%s268_s18] sm:$0xff]  ;;  %v1097_v1 = vld [vmem:[%s268_s18 + $0x8] sm:$0xff]  ;;  %vm332_vm0 = vcmask 15360   ;;  %v934_v43 = vmov 1   ;;  %v935_v55 = vmov 2  }
  0x38   : > { %v1099_v2 = vld [vmem:[%s268_s18 + $0x10] sm:$0xff]  ;;  %v305_v3 = vadd.f32 %v1097_v1, %v1095_v0  ;;  %v311_v4 = vmul.f32 %v1095_v0, %v1095_v0  ;;  %v312_v5 = vmul.f32 %v1097_v1, %v1097_v1  ;;  %v1107_v6 = vld [vmem:[%s268_s18 + $0x18] sm:$0xff]  ;;  %v329_v19 = vld [vmem:[%s1258_s2] sm:$0xff]  ;;  %817 = vset.pattern.permute.xlu1 %v934_v43  ;;  %v936_v56 = vmov 3   ;;  %s1181_s9 = sld [smem:[#allocation2]]  ;;  %s298_s12 = scalar_lea.vmem [#allocation6], %s744_s17 }
  0x39   : > { %v313_v7 = vmul.f32 %v1099_v2, %v1099_v2  ;;  %v314_v8 = vmul.f32 %v1107_v6, %v1107_v6  ;;  %v308_v10 = vadd.f32 %v1107_v6, %v1099_v2  ;;  %v414_v54 = vld [vmem:[%s1257_s1] sm:$0xff]  ;;  %v937_v57 = vmov 4   ;;  %s663_s18 = sshll.u32 %s298_s12, 4  ;;  %s757_s13 = sshll.u32 %s1009_s6, 9  ;;  %s1213_s18 = int_to_ptr.vmem [resolvable:$true] %s663_s18 }
  0x3a   : > { %306 = vadd.xlane.f32.xlu0 %v305_v3  ;;  %v315_v9 = vadd.f32 %v312_v5, %v311_v4  ;;  %v938_v58 = vmov 5   ;;  %v939_v59 = vmov 0   ;;  %v940_v60 = vmov 6   ;;  %s1211_s24 = scalar_lea.hbm %s1263_s7, %s757_s13  ;;  %s649_s6 = scalar_lea.sflag [#allocation5], %s1085_s10 }
  0x3b   : > { %v318_v11 = vadd.f32 %v314_v8, %v313_v7  ;;  %816 = vset.pattern.permute.xlu0 %v939_v59  ;;  %v382_v7 = vlaneseq  ;;  %s865_s17 = scalar_lea.vmem %s1213_s18, 512  ;;  %p1272_p12 = scmp.ne.s32.totalorder %s1268_s14, 0 }
  0x3c   : > { %316 = vadd.xlane.f32.xlu1 %v315_v9  ;;  %v373_v9 = vld [vmem:[%s1259_s3] sm:$0x1]  ;;  %p866_p11 = scmp.ne.s32.totalorder %s1213_s18, %s865_s17  ;;  %s942_s25 = smov [#allocation6]  }
  0x3d   : > { %s869_s16 = sshll.u32 %s942_s25, 4  ;;  %s870_s16 = int_to_ptr.vmem [resolvable:$false] %s869_s16 }
  0x3e   : > { %309 = vadd.xlane.f32.xlu0 %v308_v10  ;;  %p867_p13 = pnand %p866_p11, %p1272_p12  ;;  %s871_s19 = scalar_lea.vmem %s870_s16, 1024 }
  0x3f   : > { %p872_p5 = scmp.lt.s32.totalorder %s1213_s18, %s870_s16  ;;  %p873_p7 = scmp.lt.s32.totalorder %s871_s19, %s865_s17 }
  0x40   : > { %319 = vadd.xlane.f32.xlu1 %v318_v11  ;;  %v1130_v11 = vshrl.u32 %v382_v7, 7  ;;  %p868_p4 = pneg %p867_p13 }
  0x41   : > { %p874_p8 = por %p873_p7, %p872_p5 }
  0x42   : > { %v530_v59 = vsub.s32 4, %v1130_v11 }
  0x43   : > { %p875_p10 = pnand %p874_p8, %p868_p4 }
  0xc3   : > { %v307_v12 = vpop.xlane.xlu0 %306 }
  0xc4   : > { %v321_v13 = vmul.f32 %v307_v12, %v307_v12  ;;  %v376_v12 = vld [vmem:[%s1260_s4] sm:$0x1] }
  0xc5   : > { %v317_v14 = vpop.xlane.xlu1 %316 }
  0xc6   : > { %v323_v15 = vmul.f32 0.00390625, %v321_v13 }
  0xc7   : > { %v310_v16 = vpop.xlane.xlu0 %309 }
  0xc8   : > { %v325_v17 = vsub.f32 %v317_v14, %v323_v15  ;;  %v322_v18 = vmul.f32 %v310_v16, %v310_v16  ;;  %v384_v16 = vsub.s32 0, %v1130_v11 }
  0xc9   : > { %v320_v20 = vpop.xlane.xlu1 %319 }
  0xca   : > { %v327_v21 = vmul.f32 0.003921569, %v325_v17  ;;  %v324_v22 = vmul.f32 0.00390625, %v322_v18  ;;  %v423_v43 = vrot.slane %v1095_v0, %v384_v16 }
  0xcc   : > { %v330_v23 = vmul.f32 %v329_v19, %v327_v21  ;;  %v326_v24 = vsub.f32 %v320_v20, %v324_v22  ;;  %v381_v20 = vld [vmem:[%s1261_s5] sm:$0xff] }
  0xce   : > { %v333_v25 = vsel %vm332_vm0, %v330_v23, 0.0  ;;  %v328_v26 = vmul.f32 0.003921569, %v326_v24 }
  0xcf   : > { %v334_v27 = vrot.slane %v333_v25, 4 }
  0xd0   : > { %v331_v28 = vmul.f32 %v329_v19, %v328_v26 }
  0xd1   : > { %v335_v29 = vadd.f32 %v334_v27, %v333_v25 }
  0xd2   : > { %v340_v30 = vsel %vm332_vm0, %v331_v28, 0.0 }
  0xd3   : > { %v341_v31 = vrot.slane %v340_v30, 4  ;;  %v336_v32 = vrot.slane %v335_v29, 2 }
  0xd5   : > { %v342_v33 = vadd.f32 %v341_v31, %v340_v30  ;;  %v337_v34 = vadd.f32 %v336_v32, %v335_v29  ;;  %v941_v29 = vmov 7  }
  0xd7   : > { %v338_v35 = vrot.slane %v337_v34, 1  ;;  %v343_v36 = vrot.slane %v342_v33, 2 }
  0xd9   : > { %v339_v37 = vadd.f32 %v338_v35, %v337_v34  ;;  %v344_v38 = vadd.f32 %v343_v36, %v342_v33  ;;  %v446_v34 = vsub.s32 1, %v1130_v11 }
  0xdb   : > { %v347_v39 = vsel %vm332_vm0, %v339_v37, 0.0  ;;  %v345_v40 = vrot.slane %v344_v38, 1 }
  0xdc   : > { %348 = vadd.xlane.f32.xlu0 %v347_v39  ;;  %v474_v39 = vsub.s32 2, %v1130_v11 }
  0xdd   : > { %v346_v41 = vadd.f32 %v345_v40, %v344_v38  ;;  %v447_v38 = vrot.slane %v1095_v0, %v446_v34 }
  0xdf   : > { %v350_v42 = vsel %vm332_vm0, %v346_v41, 0.0 }
  0xe0   : > { %351 = vadd.xlane.f32.xlu1 %v350_v42 }
 0x165   : > { %v349_v44 = vpop.xlane.xlu0 %348 }
 0x166   : > { %v353_v45 = vmul.f32 0.5, %v349_v44  ;;  %v427_v44 = vrot.slane %v1097_v1, %v384_v16 }
 0x168   : > { %v355_v46 = vsub.f32 %v339_v37, %v353_v45  ;;  %v431_v45 = vrot.slane %v1099_v2, %v384_v16 }
 0x169   : > { %v352_v47 = vpop.xlane.xlu1 %351 }
 0x16a   : > { %v354_v48 = vmul.f32 0.5, %v352_v47  ;;  %v357_v49 = vmul.f32 %v355_v46, %v355_v46  ;;  %v502_v47 = vsub.s32 3, %v1130_v11 }
 0x16c   : > { %v356_v50 = vsub.f32 %v346_v41, %v354_v48  ;;  %v359_v51 = vsel %vm332_vm0, %v357_v49, 0.0  ;;  %v451_v41 = vrot.slane %v1097_v1, %v446_v34  ;;  %v455_v48 = vrot.slane %v1099_v2, %v446_v34 }
 0x16d   : > { %360 = vadd.xlane.f32.xlu0 %v359_v51  ;;  %v459_v49 = vrot.slane %v1107_v6, %v446_v34  ;;  %v479_v51 = vrot.slane %v1097_v1, %v474_v39 }
 0x16e   : > { %v358_v52 = vmul.f32 %v356_v50, %v356_v50 }
 0x170   : > { %v362_v53 = vsel %vm332_vm0, %v358_v52, 0.0 }
 0x171   : > { %363 = vadd.xlane.f32.xlu1 %v362_v53 }
 0x182   : > { %441 = vperm.xlu1 %817, %v414_v54  }
 0x186   : > { %818 = vset.pattern.permute.xlu1 %v935_v55 }
 0x187   : > { %469 = vperm.xlu1 %818, %v414_v54  }
 0x18b   : > { %819 = vset.pattern.permute.xlu1 %v936_v56 }
 0x18c   : > { %497 = vperm.xlu1 %819, %v414_v54  }
 0x190   : > { %820 = vset.pattern.permute.xlu1 %v937_v57 }
 0x191   : > { %525 = vperm.xlu1 %820, %v414_v54  }
 0x195   : > { %821 = vset.pattern.permute.xlu1 %v938_v58 }
 0x196   : > { %553 = vperm.xlu1 %821, %v414_v54  }
 0x19a   : > { %822 = vset.pattern.permute.xlu1 %v940_v60 }
 0x1f6   : > { %v361_v61 = vpop.xlane.xlu0 %360 }
 0x1f7   : > { %v365_v62 = vmul.f32 0.5, %v361_v61 }
 0x1f9   : > { %v367_v63 = vadd.f32 1e-05, %v365_v62 }
 0x1fa   : > { %v364_v3 = vpop.xlane.xlu1 %363 }
 0x1fb   : > { %825 = vrsqrt.f32 %v367_v63  ;;  %v366_v4 = vmul.f32 0.5, %v364_v3  ;;  %v483_v3 = vrot.slane %v1099_v2, %v474_v39 }
 0x1fd   : > { %v368_v5 = vadd.f32 1e-05, %v366_v4  ;;  %v487_v4 = vrot.slane %v1107_v6, %v474_v39 }
 0x1fe   : > { %v442_v30 = vpop.permute.xlu1 %441 }
 0x1ff   : > { %827 = vrsqrt.f32 %v368_v5  ;;  %v460_v53 = vmul.f32 %v447_v38, %v442_v30  ;;  %v462_v62 = vmul.f32 %v455_v48, %v442_v30  ;;  %v463_v63 = vmul.f32 %v459_v49, %v442_v30 }
 0x200   : > { %v543_v38 = vrot.slane %v1107_v6, %v530_v59 }
 0x202   : > { %v470_v31 = vpop.permute.xlu1 %469 }
 0x203   : > { %v489_v7 = vmul.f32 %v479_v51, %v470_v31 }
 0x207   : > { %v1141_v32 = vpop.permute.xlu1 %497 }
 0x208   : > { %v826_v8 = vpop.eup %825 }
 0x209   : > { %v371_v10 = vmul.f32 %v826_v8, %v355_v46  ;;  %v435_v46 = vrot.slane %v1107_v6, %v384_v16  ;;  %v503_v8 = vrot.slane %v1095_v0, %v502_v47 }
 0x20b   : > { %v374_v13 = vmul.f32 %v373_v9, %v371_v10 }
 0x20c   : > { %v828_v14 = vpop.eup %827  ;;  %v1143_v33 = vpop.permute.xlu1 %525 }
 0x20d   : > { %v377_v15 = vadd.f32 %v376_v12, %v374_v13  ;;  %v372_v17 = vmul.f32 %v828_v14, %v356_v50  ;;  %v475_v50 = vrot.slane %v1095_v0, %v474_v39  ;;  %v511_v13 = vrot.slane %v1099_v2, %v502_v47 }
 0x20e   : > { %v558_v14 = vsub.s32 5, %v1130_v11 }
 0x20f   : > { %v379_v18 = vmax.f32 %v377_v15, 0.0  ;;  %v375_v19 = vmul.f32 %v373_v9, %v372_v17  ;;  %v488_v5 = vmul.f32 %v475_v50, %v470_v31  ;;  %v507_v9 = vrot.slane %v1097_v1, %v502_v47 }
 0x210   : > { %v559_v39 = vrot.slane %v1095_v0, %v558_v14 }
 0x211   : > { %v385_v21 = vrot.slane %v379_v18, %v384_v16  ;;  %v378_v22 = vadd.f32 %v376_v12, %v375_v19  ;;  %v1146_v35 = vpop.permute.xlu1 %553  ;;  %v490_v18 = vmul.f32 %v483_v3, %v470_v31  ;;  %v491_v19 = vmul.f32 %v487_v4, %v470_v31 }
 0x213   : > { %v390_v23 = vmul.f32 %v385_v21, %v381_v20  ;;  %v380_v24 = vmax.f32 %v378_v22, 0.0  ;;  %v531_v21 = vrot.slane %v1095_v0, %v530_v59  ;;  %v516_v22 = vmul.f32 %v503_v8, %v1141_v32 }
 0x214   : > { %v411_v8 = vstv %s1181_s9 }
 0x215   : > { %v392_v25 = vsel %vm332_vm0, %v390_v23, 0.0  ;;  %v389_v26 = vrot.slane %v380_v24, %v384_v16  ;;  %v517_v23 = vmul.f32 %v507_v9, %v1141_v32  ;;  %v535_v24 = vrot.slane %v1097_v1, %v530_v59 }
 0x216   : > { %393 = vadd.xlane.f32.xlu0 %v392_v25 }
 0x217   : > { %v391_v27 = vmul.f32 %v389_v26, %v381_v20  ;;  %v515_v20 = vrot.slane %v1107_v6, %v502_v47 }
 0x219   : > { %v395_v28 = vsel %vm332_vm0, %v391_v27, 0.0 }
 0x21a   : > { %396 = vadd.xlane.f32.xlu1 %v395_v28  ;;  %v586_v28 = vsub.s32 6, %v1130_v11 }
 0x21c   : > { %v591_v48 = vrot.slane %v1097_v1, %v586_v28 }
 0x22b   : > { %581 = vperm.xlu1 %822, %v414_v54  }
 0x22c   : > { %417 = vperm.xlu0 %816, %v414_v54  }
 0x22f   : > { %823 = vset.pattern.permute.xlu1 %v941_v29 }
 0x230   : > { %609 = vperm.xlu1 %823, %v414_v54   ;;  %824 = vset.pattern.permute.xlu0 %v941_v29  ;;  %v461_v54 = vmul.f32 %v451_v41, %v442_v30  ;;  %v539_v29 = vrot.slane %v1099_v2, %v530_v59  ;;  %v545_v41 = vmul.f32 %v535_v24, %v1143_v33 }
 0x232   : > { %v546_v51 = vmul.f32 %v539_v29, %v1143_v33 }
 0x29f   : > { %v394_v36 = vpop.xlane.xlu0 %393 }
 0x2a0   : > { %v746_v37 = vmul.f32 -1.442695, %v394_v36  ;;  %v518_v36 = vmul.f32 %v511_v13, %v1141_v32 }
 0x2a2   : > { %829 = vpow2.f32 %v746_v37  ;;  %v519_v37 = vmul.f32 %v515_v20, %v1141_v32  ;;  %v614_v32 = vsub.s32 7, %v1130_v11  ;;  %v595_v11 = vrot.slane %v1099_v2, %v586_v28 }
 0x2a3   : > { %v397_v40 = vpop.xlane.xlu1 %396 }
 0x2a4   : > { %v747_v42 = vmul.f32 -1.442695, %v397_v40  ;;  %v544_v40 = vmul.f32 %v531_v21, %v1143_v33  ;;  %v619_v59 = vrot.slane %v1097_v1, %v614_v32  ;;  %v623_v9 = vrot.slane %v1099_v2, %v614_v32 }
 0x2a6   : > { %831 = vpow2.f32 %v747_v42  ;;  %v563_v42 = vrot.slane %v1097_v1, %v558_v14 }
 0x2a7   : > { %v418_v52 = vpop.permute.xlu0 %417  ;;  %v582_v47 = vpop.permute.xlu1 %581 }
 0x2a8   : > { %v436_v55 = vmul.f32 %v423_v43, %v418_v52  ;;  %v437_v56 = vmul.f32 %v427_v44, %v418_v52  ;;  %v438_v57 = vmul.f32 %v431_v45, %v418_v52  ;;  %v439_v58 = vmul.f32 %v435_v46, %v418_v52 }
 0x2a9   : > { %v587_v46 = vrot.slane %v1095_v0, %v586_v28  ;;  %v547_v52 = vmul.f32 %v543_v38, %v1143_v33 }
 0x2aa   : > { %v464_v60 = vadd.f32 %v460_v53, %v436_v55  ;;  %v465_v61 = vadd.f32 %v461_v54, %v437_v56  ;;  %v466_v10 = vadd.f32 %v462_v62, %v438_v57  ;;  %v467_v12 = vadd.f32 %v463_v63, %v439_v58 }
 0x2ab   : > { %v567_v53 = vrot.slane %v1099_v2, %v558_v14  ;;  %v571_v54 = vrot.slane %v1107_v6, %v558_v14  ;;  %v572_v55 = vmul.f32 %v559_v39, %v1146_v35  ;;  %v573_v56 = vmul.f32 %v563_v42, %v1146_v35 }
 0x2ac   : > { %v492_v15 = vadd.f32 %v488_v5, %v464_v60  ;;  %v493_v16 = vadd.f32 %v489_v7, %v465_v61  ;;  %v494_v26 = vadd.f32 %v490_v18, %v466_v10  ;;  %v495_v27 = vadd.f32 %v491_v19, %v467_v12  ;;  %v610_v7 = vpop.permute.xlu1 %609 }
 0x2ad   : > { %v599_v57 = vrot.slane %v1107_v6, %v586_v28  ;;  %v615_v58 = vrot.slane %v1095_v0, %v614_v32  ;;  %v600_v33 = vmul.f32 %v587_v46, %v582_v47  ;;  %v601_v62 = vmul.f32 %v591_v48, %v582_v47 }
 0x2ae   : > { %v520_v30 = vadd.f32 %v516_v22, %v492_v15  ;;  %v521_v31 = vadd.f32 %v517_v23, %v493_v16  ;;  %v522_v44 = vadd.f32 %v518_v36, %v494_v26  ;;  %v523_v45 = vadd.f32 %v519_v37, %v495_v27 }
 0x2af   : > { %v830_v17 = vpop.eup %829  ;;  %v574_v4 = vmul.f32 %v567_v53, %v1146_v35  ;;  %v575_v5 = vmul.f32 %v571_v54, %v1146_v35  ;;  %v627_v10 = vrot.slane %v1107_v6, %v614_v32  ;;  %v602_v12 = vmul.f32 %v595_v11, %v582_v47 }
 0x2b0   : > { %v404_v25 = vadd.f32 1.0, %v830_v17  ;;  %v548_v49 = vadd.f32 %v544_v40, %v520_v30  ;;  %v549_v50 = vadd.f32 %v545_v41, %v521_v31  ;;  %v550_v60 = vadd.f32 %v546_v51, %v522_v44 }
 0x2b1   : > { %v551_v61 = vadd.f32 %v547_v52, %v523_v45  ;;  %v603_v13 = vmul.f32 %v599_v57, %v582_v47  ;;  %v628_v18 = vmul.f32 %v615_v58, %v610_v7  ;;  %v629_v19 = vmul.f32 %v619_v59, %v610_v7 }
 0x2b2   : > { %833 = vrcp.f32 %v404_v25  ;;  %v576_v63 = vadd.f32 %v572_v55, %v548_v49  ;;  %v577_v3 = vadd.f32 %v573_v56, %v549_v50  ;;  %v578_v14 = vadd.f32 %v574_v4, %v550_v60 }
 0x2b3   : > { %v832_v34 = vpop.eup %831  ;;  %v579_v15 = vadd.f32 %v575_v5, %v551_v61  ;;  %v630_v23 = vmul.f32 %v623_v9, %v610_v7  ;;  %v631_v24 = vmul.f32 %v627_v10, %v610_v7 }
 0x2b4   : > { %v405_v43 = vadd.f32 1.0, %v832_v34  ;;  %v604_v16 = vadd.f32 %v600_v33, %v576_v63  ;;  %v605_v17 = vadd.f32 %v601_v62, %v577_v3  ;;  %v606_v22 = vadd.f32 %v602_v12, %v578_v14 }
 0x2b5   : > { %v607_v35 = vadd.f32 %v603_v13, %v579_v15 }
 0x2b6   : > { %835 = vrcp.f32 %v405_v43  ;;  %v632_v25 = vadd.f32 %v628_v18, %v604_v16  ;;  %v633_v26 = vadd.f32 %v629_v19, %v605_v17  ;;  %v634_v38 = vadd.f32 %v630_v23, %v606_v22 }
 0x2b7   : > { %v635_v39 = vadd.f32 %v631_v24, %v607_v35 }
 0x2bf   : > { %v834_v20 = vpop.eup %833 }
 0x2c0   : > { %v412_v21 = vmul.f32 %v834_v20, %v411_v8 }
 0x2c2   : > { %v636_v27 = vmul.f32 %v412_v21, %v1095_v0  ;;  %v637_v28 = vmul.f32 %v412_v21, %v1097_v1 }
 0x2c3   : > { %v836_v29 = vpop.eup %835 }
 0x2c4   : > { %v413_v30 = vmul.f32 %v836_v29, %v411_v8  ;;  %v640_v31 = vadd.f32 %v636_v27, %v632_v25  ;;  %v641_v34 = vadd.f32 %v637_v28, %v633_v26 }
 0x2c6   : > { %v638_v36 = vmul.f32 %v413_v30, %v1099_v2  ;;  %v639_v37 = vmul.f32 %v413_v30, %v1107_v6  ;;  %644 = vst [vmem:[%s298_s12] sm:$0xff] %v640_v31  ;;  %645 = vst [vmem:[%s298_s12 + $0x8] sm:$0xff] %v641_v34 }
 0x2c8   : > { %v642_v0 = vadd.f32 %v638_v36, %v634_v38  ;;  %v643_v1 = vadd.f32 %v639_v37, %v635_v39 }
 0x2ca   : > { %646 = vst [vmem:[%s298_s12 + $0x10] sm:$0xff] %v642_v0  ;;  %647 = vst [vmem:[%s298_s12 + $0x18] sm:$0xff] %v643_v1 }
 0x2cb   : > { %878 = shalt.err (!%p875_p10)
}
 0x2cc   : > { %s879_s20 = scalar_lea.hbm %s1211_s24, 512  ;;  %s883_s9 = scalar_lea.hbm %s1263_s7, 1024 }
 0x2cd   : > { %p880_p0 = scmp.ne.s32.totalorder %s1211_s24, %s879_s20  ;;  %p884_p1 = scmp.lt.s32.totalorder %s1211_s24, %s1263_s7 }
 0x2ce   : > { %p885_p3 = scmp.lt.s32.totalorder %s883_s9, %s879_s20 }
 0x2cf   : > { %p881_p2 = pnand %p880_p0, %p1272_p12 }
 0x2d0   : > { %p886_p6 = por %p885_p3, %p884_p1 }
 0x2d1   : > { %p882_p9 = pneg %p881_p2 }
 0x2d3   : > { %p887_p11 = pnand %p886_p6, %p882_p9 }
 0x2d5   : > { %890 = shalt.err (!%p887_p11)
}
 0x2d6   : > { %s943_s21 = smov 256   ;;  %s944_s23 = smov 16  }
 0x2d7   : > { %760 = dma.vmem_to_hbm [thread:$0]  (%p1272_p12), %s1213_s18, 512, %s1211_s24, %s649_s6, %s943_s21, %s943_s21, %s944_s23  }
 0x2d8 PF: > { %s678_s17 = sand.u32 1, %s917_s26   ;;  %p1273_p13 = scmp.ne.s32.totalorder %s1269_s15, 0 }
 0x2d9   : > { %p1274_p4 = scmp.ge.s32.totalorder %s929_s29, 2  ;;  %s679_s25 = scalar_lea.sflag [#allocation5], %s678_s17 }
 0x2db   : > { %p767_p5 = pnand %p1274_p4, %p1273_p13 }
 0x2dd   : > { %p768_p7 = pneg %p767_p5 }
 0x2df   : > { %912 = dma.done.wait (%p768_p7), %s679_s25, 512  }
 0x2e0   : > { %914 = vsyncadd (%p768_p7), %s679_s25, 4294966784  ;;  %p21_p8 = scmp.ge.s32.totalorder %s1013_s8, 4   ;;  %s1275_s26 = smov %s921_s27 }
 0x2e1   : > { %s1276_s27 = smov %s925_s28  ;;  %s1277_s28 = smov %s1025_s11 }
 0x2e2   : > { %s1278_s29 = smov %s1013_s8  ;;  %23 = sbr.rel (!%p21_p8) target bundleno = 7 (0x7), region = 93 }
 0x2e7   :  { %684 = vsyncpa [#allocation4], 1 }
 0x2e8   :  { %686 = vsyncpa [#allocation4 + $0x1], 1 }
 0x2e9   :  { %687 = vsyncpa [#allocation5], 1 }
 0x2ea   :  { %689 = vsyncpa [#allocation5 + $0x1], 1 }

</bundles_post_ra>
